<compile_context>
chip_gen: v6e
topology: v6e:2x2x1
jax: 0.10.0
libtpu: 0.0.40
codegen_flags: <defaults>
</compile_context>

<pallas_src>
import functools

import numpy as np
import jax
import jax.numpy as jnp
from jax.experimental import pallas as pl
from jax.experimental.pallas import tpu as pltpu

_LANE = 128


def _round_up(x, m):
    return ((x + m - 1) // m) * m


def _softplus(x):
    # softplus(x, beta=1) = log(1 + exp(x)), numerically stable form.
    return jnp.maximum(x, 0.0) + jnp.log(1.0 + jnp.exp(-jnp.abs(x)))


def tmg_kernel(vht_ref, obf_ref, wh_ref, wob_ref, out_ref, *, precision):
    # --- Order-book bilinear forms: one MXU matmul, 128-lane-wide result so the
    # following transpose is tile-aligned ((tn,128)->(128,tn), XLU-only work).
    h_ob = jnp.dot(obf_ref[...], wob_ref[...],
                   preferred_element_type=jnp.float32, precision=precision)
    h_ob_t = jnp.transpose(h_ob)                      # (128, tn), lane-dense rows
    mu_h1 = h_ob_t[0:1, :]                            # U @ obf @ V
    g_order = _softplus(h_ob_t[1:2, :])               # softplus(A @ obf @ B)

    # --- Volatility-history contractions, lane-dense by construction: (2, tn).
    h_hist = jnp.dot(wh_ref[...], vht_ref[...],
                     preferred_element_type=jnp.float32, precision=precision)
    mu_h0 = jnp.maximum(h_hist[0:1, :], 0.0)          # relu(phi . vh)
    g_hist = _softplus(h_hist[1:2, :])                # softplus(theta . vh)

    # Exact reciprocal: at lane-dense layout this touches ~tn/128 vregs (noise).
    gating = g_hist * pl.reciprocal(g_hist + g_order + 1e-6, approx=False)
    mixture = gating * mu_h0 + (1.0 - gating) * mu_h1

    # Lane-dense (4, tn) output block, full-lane stores, single writeback DMA.
    # NOTE: on a ragged tail block, columns past N may transiently hold inf/NaN
    # (exp/log of uninitialized pad rows); they are masked out of the writeback.
    out_ref[0:1, :] = mixture
    out_ref[1:2, :] = mu_h0
    out_ref[2:3, :] = mu_h1
    out_ref[3:4, :] = gating


def tm_g_forward(vol_history, order_book_feats, params, *,
                 tile_n=8192, vmem_budget_bytes=24 * 1024 * 1024,
                 precision=jax.lax.Precision.HIGHEST):
    """vol_history: (N, lv), order_book_feats: (N, n_features, lb).

    Returns (mixture_mean, mu_h0, mu_h1, gating), each (N,) float32.
    """
    vh = jnp.asarray(vol_history)
    obf = jnp.asarray(order_book_feats)
    N, lv = vh.shape
    _, F, lb = obf.shape
    K = F * lb

    # Keep the big array in its incoming dtype (bf16 passes straight through,
    # halving HBM traffic); only non-float inputs get upcast.
    if obf.dtype not in (jnp.float32, jnp.bfloat16):
        obf = obf.astype(jnp.float32)
    if vh.dtype != obf.dtype:
        vh = vh.astype(obf.dtype)

    obf_flat = obf.reshape(N, K)     # free, contiguous reshape of the big array
    vh_t = vh.T                      # (lv, N): tiny relayout -> lane-dense hist matmul

    phi = params["phi"].reshape(lv).astype(jnp.float32)
    theta = params["theta"].reshape(lv).astype(jnp.float32)
    U = params["U"].reshape(F).astype(jnp.float32)
    A = params["A"].reshape(F).astype(jnp.float32)
    V = params["V"].reshape(lb).astype(jnp.float32)
    B = params["B"].reshape(lb).astype(jnp.float32)

    # Pack the six 1-D parameters into two tiny weight slabs.
    w_hist = jnp.stack([phi, theta], axis=0)                       # (2, lv)
    uv = jnp.outer(U, V).reshape(K)                                # vec(U ⊗ V)
    ab = jnp.outer(A, B).reshape(K)                                # vec(A ⊗ B)
    w_ob = (jnp.zeros((K, _LANE), jnp.float32)
            .at[:, 0].set(uv)
            .at[:, 1].set(ab))                                     # (K, 128)

    # ---- Tile selection ------------------------------------------------------
    itemsize = jnp.dtype(obf.dtype).itemsize
    k_pad = _round_up(K, _LANE)
    # Dominant per-row VMEM: double-buffered obf tile + f32 matmul result + its
    # transpose (vh^T / weight / output tiles are comparatively tiny).
    bytes_per_row = 2 * k_pad * itemsize + 2 * _LANE * 4
    tn_budget = max(_LANE, (vmem_budget_bytes // bytes_per_row) // _LANE * _LANE)
    tn_split = _round_up(pl.cdiv(N, 2), _LANE)   # >=2 grid steps -> both v7x TCs busy
    tn = max(_LANE, min(tile_n, tn_budget, tn_split))
    grid = (pl.cdiv(N, tn),)

    out = pl.pallas_call(
        functools.partial(tmg_kernel, precision=precision),
        grid=grid,
        in_specs=[
            pl.BlockSpec((lv, tn), lambda i: (0, i)),      # vh^T
            pl.BlockSpec((tn, K), lambda i: (i, 0)),       # flattened order-book feats
            pl.BlockSpec((2, lv), lambda i: (0, 0)),       # [phi; theta]
            pl.BlockSpec((K, _LANE), lambda i: (0, 0)),    # [vec(U⊗V) | vec(A⊗B) | 0 ...]
        ],
        out_specs=pl.BlockSpec((4, tn), lambda i: (0, i)),
        out_shape=jax.ShapeDtypeStruct((4, N), jnp.float32),
        compiler_params=pltpu.CompilerParams(
            dimension_semantics=("parallel",),
            vmem_limit_bytes=32 * 1024 * 1024),
    )(vh_t, obf_flat, w_hist, w_ob)

    return out[0], out[1], out[2], out[3]


if __name__ == "__main__":
    # Small shapes consistent with the module defaults: lv=5, lb=30, n_features=4.
    N, lv, lb, F = 512, 5, 30, 4

    key = jax.random.PRNGKey(0)
    ks = jax.random.split(key, 8)

    def xavier_1d(k, dim):
        # torch.nn.init.xavier_uniform_ on a (1, dim) matrix.
        bound = float(np.sqrt(6.0 / (dim + 1)))
        return jax.random.uniform(k, (dim,), jnp.float32, -bound, bound)

    params = {
        "phi": xavier_1d(ks[0], lv),
        "U": xavier_1d(ks[1], F),
        "V": xavier_1d(ks[2], lb),
        "theta": xavier_1d(ks[3], lv),
        "A": xavier_1d(ks[4], F),
        "B": jnp.zeros((lb,), jnp.float32).at[0].set(1.0),  # fixed buffer in the module
    }

    vol_history = jax.random.normal(ks[5], (N, lv), jnp.float32)
    order_book_feats = jax.random.normal(ks[6], (N, F, lb), jnp.float32)

    outs = tm_g_forward(vol_history, order_book_feats, params)
    outs = jax.block_until_ready(outs)

    # Pure-numpy (float64) reference for correctness.
    vh_np = np.asarray(vol_history, np.float64)
    obf_np = np.asarray(order_book_feats, np.float64)
    phi_np = np.asarray(params["phi"], np.float64)
    theta_np = np.asarray(params["theta"], np.float64)
    U_np = np.asarray(params["U"], np.float64)
    A_np = np.asarray(params["A"], np.float64)
    V_np = np.asarray(params["V"], np.float64)
    B_np = np.asarray(params["B"], np.float64)

    def np_softplus(x):
        return np.maximum(x, 0.0) + np.log1p(np.exp(-np.abs(x)))

    mu_h0_ref = np.maximum(vh_np @ phi_np, 0.0)
    mu_h1_ref = np.einsum("f,nfl,l->n", U_np, obf_np, V_np)
    g_hist_ref = np_softplus(vh_np @ theta_np)
    g_order_ref = np_softplus(np.einsum("f,nfl,l->n", A_np, obf_np, B_np))
    gating_ref = g_hist_ref / (g_hist_ref + g_order_ref + 1e-6)
    mix_ref = gating_ref * mu_h0_ref + (1.0 - gating_ref) * mu_h1_ref
    refs = (mix_ref, mu_h0_ref, mu_h1_ref, gating_ref)

    for got, want in zip(outs, refs):
        np.testing.assert_allclose(np.asarray(got), want, rtol=1e-4, atol=1e-5)

    # TODO(synk): loss_fn / RAdam training loop / dataframe prep are host-side
    # training utilities, not part of the forward pass, and are not ported.
    print("KERNEL_OK")
</pallas_src>

<mosaic_0001>
module attributes {stable_mosaic.version = 11 : i64} {
  func.func @tmg_kernel(%arg0: i32, %arg1: memref<5x256xf32, #tpu.memory_space<vmem>>, %arg2: memref<256x120xf32, #tpu.memory_space<vmem>>, %arg3: memref<2x5xf32, #tpu.memory_space<vmem>>, %arg4: memref<120x128xf32, #tpu.memory_space<vmem>>, %arg5: memref<4x256xf32, #tpu.memory_space<vmem>>) attributes {dimension_semantics = [#tpu.dimension_semantics<parallel>], iteration_bounds = array<i64: 2>, scalar_prefetch = 0 : i64, scratch_operands = 0 : i64, tpu.core_type = #tpu.core_type<tc>, window_params = [{transform_indices = @transform_0, window_bounds = array<i64: 5, 256>}, {transform_indices = @transform_1, window_bounds = array<i64: 256, 120>}, {pipeline_mode = #tpu.pipeline_mode<synchronous>, transform_indices = @transform_2, window_bounds = array<i64: 2, 5>}, {pipeline_mode = #tpu.pipeline_mode<synchronous>, transform_indices = @transform_3, window_bounds = array<i64: 120, 128>}, {transform_indices = @transform_4, window_bounds = array<i64: 4, 256>}]} {
    %c0 = arith.constant 0 : index
    %c0_0 = arith.constant 0 : index
    %0 = vector.load %arg2[%c0, %c0_0] : memref<256x120xf32, #tpu.memory_space<vmem>>, vector<256x120xf32>
    %c0_1 = arith.constant 0 : index
    %c0_2 = arith.constant 0 : index
    %1 = vector.load %arg4[%c0_1, %c0_2] : memref<120x128xf32, #tpu.memory_space<vmem>>, vector<120x128xf32>
    %cst = arith.constant dense<0.000000e+00> : vector<256x128xf32>
    %2 = tpu.matmul %0, %1, %cst {dimension_numbers = #tpu.dot_dimension_numbers<[1], [0], [0], [1], [0, 0, 1, 1], [], []>, precision = #tpu.contract_precision<fp32>} : vector<256x120xf32>, vector<120x128xf32>, vector<256x128xf32> -> vector<256x128xf32>
    %3 = tpu.transpose %2, [1, 0] : vector<256x128xf32> -> vector<128x256xf32>
    %4 = vector.extract_strided_slice %3 {offsets = [0, 0], sizes = [1, 256], strides = [1, 1]} : vector<128x256xf32> to vector<1x256xf32>
    %5 = vector.extract_strided_slice %3 {offsets = [1, 0], sizes = [1, 256], strides = [1, 1]} : vector<128x256xf32> to vector<1x256xf32>
    %cst_3 = arith.constant 0.000000e+00 : f32
    %6 = vector.broadcast %cst_3 : f32 to vector<1x256xf32>
    %7 = arith.maximumf %5, %6 : vector<1x256xf32>
    %8 = math.absf %5 : vector<1x256xf32>
    %cst_4 = arith.constant 0.000000e+00 : f32
    %9 = vector.broadcast %cst_4 : f32 to vector<1x256xf32>
    %10 = arith.subf %9, %8 : vector<1x256xf32>
    %11 = math.exp %10 : vector<1x256xf32>
    %cst_5 = arith.constant 1.000000e+00 : f32
    %12 = vector.broadcast %cst_5 : f32 to vector<1x256xf32>
    %13 = arith.addf %12, %11 : vector<1x256xf32>
    %14 = math.log %13 : vector<1x256xf32>
    %15 = arith.addf %7, %14 : vector<1x256xf32>
    %c0_6 = arith.constant 0 : index
    %c0_7 = arith.constant 0 : index
    %16 = vector.load %arg3[%c0_6, %c0_7] : memref<2x5xf32, #tpu.memory_space<vmem>>, vector<2x5xf32>
    %c0_8 = arith.constant 0 : index
    %c0_9 = arith.constant 0 : index
    %17 = vector.load %arg1[%c0_8, %c0_9] : memref<5x256xf32, #tpu.memory_space<vmem>>, vector<5x256xf32>
    %cst_10 = arith.constant dense<0.000000e+00> : vector<2x256xf32>
    %18 = tpu.matmul %16, %17, %cst_10 {dimension_numbers = #tpu.dot_dimension_numbers<[1], [0], [0], [1], [0, 0, 1, 1], [], []>, precision = #tpu.contract_precision<fp32>} : vector<2x5xf32>, vector<5x256xf32>, vector<2x256xf32> -> vector<2x256xf32>
    %19 = vector.extract_strided_slice %18 {offsets = [0, 0], sizes = [1, 256], strides = [1, 1]} : vector<2x256xf32> to vector<1x256xf32>
    %cst_11 = arith.constant 0.000000e+00 : f32
    %20 = vector.broadcast %cst_11 : f32 to vector<1x256xf32>
    %21 = arith.maximumf %19, %20 : vector<1x256xf32>
    %22 = vector.extract_strided_slice %18 {offsets = [1, 0], sizes = [1, 256], strides = [1, 1]} : vector<2x256xf32> to vector<1x256xf32>
    %cst_12 = arith.constant 0.000000e+00 : f32
    %23 = vector.broadcast %cst_12 : f32 to vector<1x256xf32>
    %24 = arith.maximumf %22, %23 : vector<1x256xf32>
    %25 = math.absf %22 : vector<1x256xf32>
    %cst_13 = arith.constant 0.000000e+00 : f32
    %26 = vector.broadcast %cst_13 : f32 to vector<1x256xf32>
    %27 = arith.subf %26, %25 : vector<1x256xf32>
    %28 = math.exp %27 : vector<1x256xf32>
    %cst_14 = arith.constant 1.000000e+00 : f32
    %29 = vector.broadcast %cst_14 : f32 to vector<1x256xf32>
    %30 = arith.addf %29, %28 : vector<1x256xf32>
    %31 = math.log %30 : vector<1x256xf32>
    %32 = arith.addf %24, %31 : vector<1x256xf32>
    %33 = arith.addf %32, %15 : vector<1x256xf32>
    %cst_15 = arith.constant 9.99999997E-7 : f32
    %34 = vector.broadcast %cst_15 : f32 to vector<1x256xf32>
    %35 = arith.addf %33, %34 : vector<1x256xf32>
    %36 = tpu.reciprocal %35 : vector<1x256xf32> -> vector<1x256xf32>
    %37 = arith.mulf %32, %36 : vector<1x256xf32>
    %38 = arith.mulf %37, %21 : vector<1x256xf32>
    %cst_16 = arith.constant 1.000000e+00 : f32
    %39 = vector.broadcast %cst_16 : f32 to vector<1x256xf32>
    %40 = arith.subf %39, %37 : vector<1x256xf32>
    %41 = arith.mulf %40, %4 : vector<1x256xf32>
    %42 = arith.addf %38, %41 : vector<1x256xf32>
    %c0_17 = arith.constant 0 : index
    %c0_18 = arith.constant 0 : index
    %43 = vector.load %arg5[%c0_17, %c0_18] : memref<4x256xf32, #tpu.memory_space<vmem>>, vector<1x256xf32>
    tpu.vector_store %arg5[%c0_17, %c0_18], %42 {strides = array<i32>} : memref<4x256xf32, #tpu.memory_space<vmem>>, vector<1x256xf32>,
    %c1 = arith.constant 1 : index
    %c0_19 = arith.constant 0 : index
    %44 = vector.load %arg5[%c1, %c0_19] : memref<4x256xf32, #tpu.memory_space<vmem>>, vector<1x256xf32>
    tpu.vector_store %arg5[%c1, %c0_19], %21 {strides = array<i32>} : memref<4x256xf32, #tpu.memory_space<vmem>>, vector<1x256xf32>,
    %c2 = arith.constant 2 : index
    %c0_20 = arith.constant 0 : index
    %45 = vector.load %arg5[%c2, %c0_20] : memref<4x256xf32, #tpu.memory_space<vmem>>, vector<1x256xf32>
    tpu.vector_store %arg5[%c2, %c0_20], %4 {strides = array<i32>} : memref<4x256xf32, #tpu.memory_space<vmem>>, vector<1x256xf32>,
    %c3 = arith.constant 3 : index
    %c0_21 = arith.constant 0 : index
    %46 = vector.load %arg5[%c3, %c0_21] : memref<4x256xf32, #tpu.memory_space<vmem>>, vector<1x256xf32>
    tpu.vector_store %arg5[%c3, %c0_21], %37 {strides = array<i32>} : memref<4x256xf32, #tpu.memory_space<vmem>>, vector<1x256xf32>,
    return
  }
  func.func @transform_0(%arg0: i32) -> (i32, i32) {
    %c0_i32 = arith.constant 0 : i32
    %c0_i32_0 = arith.constant 0 : i32
    return %c0_i32, %arg0 : i32, i32
  }
  func.func @transform_1(%arg0: i32) -> (i32, i32) {
    %c0_i32 = arith.constant 0 : i32
    %c0_i32_0 = arith.constant 0 : i32
    return %arg0, %c0_i32 : i32, i32
  }
  func.func @transform_2(%arg0: i32) -> (i32, i32) {
    %c0_i32 = arith.constant 0 : i32
    %c0_i32_0 = arith.constant 0 : i32
    %c0_i32_1 = arith.constant 0 : i32
    return %c0_i32, %c0_i32_0 : i32, i32
  }
  func.func @transform_3(%arg0: i32) -> (i32, i32) {
    %c0_i32 = arith.constant 0 : i32
    %c0_i32_0 = arith.constant 0 : i32
    %c0_i32_1 = arith.constant 0 : i32
    return %c0_i32, %c0_i32_0 : i32, i32
  }
  func.func @transform_4(%arg0: i32) -> (i32, i32) {
    %c0_i32 = arith.constant 0 : i32
    %c0_i32_0 = arith.constant 0 : i32
    return %c0_i32, %arg0 : i32, i32
  }
}

</mosaic_0001>

<bundles_post_ra>
// kernel: tpu_custom_call.1
= control target key start
LH: loop header
LB: loop body
LE: loop exit
PB: predicated region body
PF: predicated region fallthrough
CT: control target
= control target key end

     0   :  { %9 = vsyncpa [#allocation3], 0  ;;  %s5357_s0 = inlined_call_operand.vmem [shape: f32[5,512], index: 0, kind: input, shape index: {}]   ;;  %s5358_s1 = inlined_call_operand.vmem [shape: f32[512,120], index: 1, kind: input, shape index: {}]   ;;  %s5359_s2 = inlined_call_operand.vmem [shape: f32[2,5], index: 2, kind: input, shape index: {}]   ;;  %s5360_s3 = inlined_call_operand.vmem [shape: f32[120,128], index: 3, kind: input, shape index: {}]   ;;  %s5361_s4 = inlined_call_operand.hbm [shape: f32[4,512], index: 4, kind: output, shape index: {}]  }
   0x1   :  { %11 = vsyncpa [#allocation3 + $0x1], 0  ;;  %s4019_s15 = smov 0   ;;  %s4021_s16 = smov 0  }
   0x2   :  { %s4023_s17 = smov 0   ;;  %s4025_s18 = smov 0  }
   0x3 LB: > { %s4040_s19 = sadd.s32 4294967295, %s3989_s18   ;;  %s3100_s20 = sadd.s32 4294967294, %s3989_s18   ;;  %s3989_s18 = sphi %s4025_s18, %s5617_s18   ;;  %s3985_s17 = sphi %s4023_s17, %s5616_s17   ;;  %s3981_s16 = sphi %s4021_s16, %s5615_s16   ;;  %s3977_s15 = sphi %s4019_s15, %s5614_s15  }
   0x4   : > { %s4044_s21 = sadd.s32 1, %s3989_s18   ;;  %s118_s22 = sadd.s32 1, %s3985_s17 }
   0x5   : > { %s115_s23 = ssub.s32 %s3989_s18, %s4044_s21  ;;  %p128_p0 = scmp.ne.s32.totalorder %s3985_s17, %s3981_s16 }
   0x6   : > { %p116_p1 = scmp.eq.s32.totalorder %s115_s23, 0  ;;  %p129_p2 = scmp.eq.s32.totalorder %s4040_s19, 1 }
   0x7   : > { %p134_p3 = scmp.ne.s32.totalorder %s3981_s16, %s3977_s15  ;;  %p135_p4 = scmp.eq.s32.totalorder %s3100_s20, 1 }
   0x8   : > { %s4055_s24 = scalar_select %p116_p1, %s3985_s17, %s118_s22  }
   0x9   : > { %p4057_p5 = por %p129_p2, %p128_p0  ;;  %p4061_p6 = por %p135_p4, %p134_p3 }
   0xa   : > { %p3103_p7 = scmp.ge.s32.totalorder %s3989_s18, 1  ;;  %p177_p8 = scmp.lt.s32.totalorder %s3989_s18, 3 }
   0xc   : > { %p178_p9 = pnand %p3103_p7, %p177_p8 }
   0xe   : > { %181 = sbr.rel (%p178_p9) target bundleno = 630 (0x276), region = 36 }
  0x13   : > { %v267_v0 = vld [vmem:[%s5360_s3 + $0x70] sm:$0xff]  ;;  %v266_v1 = vld [vmem:[%s5360_s3 + $0x68] sm:$0xff]  ;;  %v265_v2 = vld [vmem:[%s5360_s3 + $0x60] sm:$0xff]  ;;  %s3107_s7 = sshll.u32 %s4040_s19, 5  ;;  %vm268_vm0 = vcmask 982016   ;;  %s3105_s28 = sshll.u32 %s4040_s19, 1 }
  0x14   : > { %v4077_v3 = vand.u32 4294901760, %v267_v0  ;;  %v4079_v4 = vand.u32 4294901760, %v266_v1  ;;  %v4081_v5 = vand.u32 4294901760, %v265_v2  ;;  %v264_v6 = vld [vmem:[%s5360_s3 + $0x58] sm:$0xff]  ;;  %v263_v7 = vld [vmem:[%s5360_s3 + $0x50] sm:$0xff]  ;;  %v262_v8 = vld [vmem:[%s5360_s3 + $0x48] sm:$0xff] }
  0x15   : > { %v4092_v9 = vand.u32 4294901760, %v264_v6  ;;  %v4094_v10 = vand.u32 4294901760, %v263_v7  ;;  %v4096_v11 = vand.u32 4294901760, %v262_v8  ;;  %v261_v12 = vld [vmem:[%s5360_s3 + $0x40] sm:$0xff]  ;;  %v260_v13 = vld [vmem:[%s5360_s3 + $0x38] sm:$0xff]  ;;  %v259_v18 = vld [vmem:[%s5360_s3 + $0x30] sm:$0xff] }
  0x16   : > { %3400 = vmatprep.subr.mxu0 %v4077_v3  ;;  %v4106_v14 = vsub.f32 %v267_v0, %v4077_v3  ;;  %v4109_v15 = vsub.f32 %v266_v1, %v4079_v4  ;;  %v4111_v16 = vand.u32 4294901760, %v261_v12  ;;  %v4114_v17 = vsub.f32 %v265_v2, %v4081_v5  ;;  %p215_p10 = scmp.lt.s32.totalorder %s3107_s7, 63  ;;  %v258_v25 = vld [vmem:[%s5360_s3 + $0x28] sm:$0xff]  ;;  %v257_v30 = vld [vmem:[%s5360_s3 + $0x20] sm:$0xff]  ;;  %v256_v38 = vld [vmem:[%s5360_s3 + $0x18] sm:$0xff]  ;;  %p209_p11 = scmp.lt.s32.totalorder %s3105_s28, 3 }
  0x17   : > { %3401 = vmatpush3.msra.mxu0 %v4077_v3  ;;  %v4121_v19 = vsub.f32 %v264_v6, %v4092_v9  ;;  %v4124_v20 = vsub.f32 %v263_v7, %v4094_v10  ;;  %v4136_v24 = vand.u32 4294901760, %v260_v13  ;;  %v4145_v27 = vand.u32 4294901760, %v259_v18  ;;  %v255_v43 = vld [vmem:[%s5360_s3 + $0x10] sm:$0xff]  ;;  %v254_v55 = vld [vmem:[%s5360_s3 + $0x8] sm:$0xff]  ;;  %s205_s10 = sand.u32 1, %s3981_s16  }
  0x18   : > { %3402 = vmatprep.subr.mxu0 %v4079_v4  ;;  %v4128_v21 = vand.u32 4294901760, %v4106_v14  ;;  %v4131_v22 = vand.u32 4294901760, %v4109_v15  ;;  %v4134_v23 = vand.u32 4294901760, %v4114_v17  ;;  %s5619_s7 = smov (!%p215_p10, %s3107_s7), 63  ;;  %v4151_v29 = vsub.f32 %v262_v8, %v4096_v11  ;;  %s5621_s28 = smov (!%p209_p11, %s3105_s28), 3 }
  0x19   : > { %3403 = vmatpush3.msra.mxu0 %v4079_v4  ;;  %v4143_v26 = vand.u32 4294901760, %v4121_v19  ;;  %v4148_v28 = vand.u32 4294901760, %v4124_v20  ;;  %v4164_v34 = vsub.f32 %v261_v12, %v4111_v16  ;;  %s3108_s8 = sshll.u32 %s5619_s7, 3  ;;  %v4169_v36 = vand.u32 4294901760, %v258_v25  ;;  %s3106_s29 = sshll.u32 %s5621_s28, 3 }
  0x1a   : > { %5463 = vst [vmem:[#allocation5_spill] sm:$0xff] %v4128_v21  ;;  %5464 = vst [vmem:[#allocation6_spill] sm:$0xff] %v4131_v22  ;;  %3404 = vmatprep.subr.mxu0 %v4081_v5  ;;  %v771_v31 = vsub.f32 %v4106_v14, %v4128_v21  ;;  %v778_v32 = vsub.f32 %v4109_v15, %v4131_v22  ;;  %v785_v33 = vsub.f32 %v4114_v17, %v4134_v23  ;;  %s4180_s13 = scalar_lea.vmem %s5358_s1, %s3108_s8  ;;  %s212_s6 = scalar_lea.vmem %s5357_s0, %s3106_s29  ;;  %vm2415_vm1 = vcmask 1044480  }
  0x1b   : > { %5465 = vst [vmem:[#allocation7_spill] sm:$0xff] %v4134_v23  ;;  %5466 = vst [vmem:[#allocation8_spill] sm:$0xff] %v4143_v26  ;;  %3405 = vmatpush3.msra.mxu0 %v4081_v5  ;;  %v792_v35 = vsub.f32 %v4121_v19, %v4143_v26  ;;  %v4172_v37 = vand.u32 4294901760, %v4151_v29  ;;  %v799_v41 = vsub.f32 %v4124_v20, %v4148_v28  ;;  %v4185_v42 = vand.u32 4294901760, %v257_v30  ;;  %v221_v46 = vld [vmem:[%s4180_s13] sm:$0xff]  ;;  %v222_v51 = vld [vmem:[%s4180_s13 + $0x8] sm:$0xff] }
  0x1c   : > { %5467 = vst [vmem:[#allocation9_spill] sm:$0xff] %v4148_v28  ;;  %3406 = vmatprep.subr.mxu0 %v4092_v9  ;;  %v772_v39 = vand.u32 4294901760, %v771_v31  ;;  %v779_v40 = vand.u32 4294901760, %v778_v32  ;;  %v4192_v44 = vand.u32 4294901760, %v4164_v34  ;;  %v4195_v45 = vsub.f32 %v260_v13, %v4136_v24  ;;  %v223_v8 = vld [vmem:[%s4180_s13 + $0x10] sm:$0xff]  ;;  %v229_v28 = vld [vmem:[%s4180_s13 + $0x40] sm:$0xff] }
  0x1d   : > { %5468 = vst [vmem:[#allocation10_spill] sm:$0xff] %v4172_v37  ;;  %3407 = vmatpush3.msra.mxu0 %v4092_v9  ;;  %v786_v47 = vand.u32 4294901760, %v785_v33  ;;  %v793_v48 = vand.u32 4294901760, %v792_v35  ;;  %v4199_v49 = vand.u32 4294901760, %v256_v38  ;;  %v4202_v50 = vsub.f32 %v259_v18, %v4145_v27  ;;  %v253_v18 = vld [vmem:[%s5360_s3] sm:$0xff]  ;;  %v230_v26 = vld [vmem:[%s4180_s13 + $0x48] sm:$0xff] }
  0x1e   : > { %5469 = vst [vmem:[#allocation11_spill] sm:$0xff] %v4192_v44  ;;  %3408 = vmatprep.subr.mxu0 %v4094_v10  ;;  %3478 = vmatprep.subr.mxu1 %v772_v39  ;;  %v806_v52 = vsub.f32 %v4151_v29, %v4172_v37  ;;  %v4209_v53 = vand.u32 4294901760, %v4195_v45  ;;  %v4211_v54 = vand.u32 4294901760, %v255_v43  ;;  %v4217_v56 = vsub.f32 %v258_v25, %v4169_v36  ;;  %s3104_s11 = sshll.u32 %s205_s10, 3  ;;  %s3015_s23 = scalar_lea.sflag [#allocation3], %s205_s10 }
  0x1f   : > { %3409 = vmatpush3.msra.mxu0 %v4094_v10  ;;  %3479 = vmatpush3.msra.mxu1 %v772_v39  ;;  %v800_v57 = vand.u32 4294901760, %v799_v41  ;;  %v4221_v58 = vand.u32 4294901760, %v4202_v50  ;;  %v4224_v59 = vsub.f32 %v257_v30, %v4185_v42  ;;  %v270_v60 = vsel %vm268_vm0, %v221_v46, 0  ;;  %s5290_s12 = scalar_lea.vmem [#allocation2], %s3104_s11 }
  0x20   : > { %5470 = vst [vmem:[#allocation12_spill] sm:$0xff] %v4209_v53  ;;  %5471 = vst [vmem:[#allocation13_spill] sm:$0xff] %v4211_v54  ;;  %3410 = vmatprep.subr.mxu0 %v4096_v11  ;;  %3480 = vmatprep.subr.mxu1 %v779_v40  ;;  %v813_v61 = vsub.f32 %v4164_v34, %v4192_v44  ;;  %v4231_v62 = vand.u32 4294901760, %v4217_v56  ;;  %v4233_v63 = vand.u32 4294901760, %v270_v60  ;;  %v273_v0 = vsel %vm268_vm0, %v222_v51, 0  ;;  %s3029_s7 = sshll.u32 %s5290_s12, 4  ;;  %s3030_s7 = int_to_ptr.vmem [resolvable:$true] %s3029_s7 }
  0x21   : > { %5472 = vst [vmem:[#allocation14_spill] sm:$0xff] %v4221_v58  ;;  %3411 = vmatpush3.msra.mxu0 %v4096_v11  ;;  %3481 = vmatpush3.msra.mxu1 %v779_v40  ;;  %v4237_v1 = vand.u32 4294901760, %v254_v55  ;;  %v4240_v2 = vand.u32 4294901760, %v4224_v59  ;;  %v4242_v6 = vand.u32 4294901760, %v273_v0  ;;  %v4245_v7 = vsub.f32 %v256_v38, %v4199_v49  ;;  %v224_v38 = vld [vmem:[%s4180_s13 + $0x18] sm:$0xff]  ;;  %s3929_s27 = scalar_lea.vmem %s3030_s7, 128 }
  0x22   : > { %5473 = vst [vmem:[#allocation15_spill] sm:$0xff] %v4231_v62  ;;  %5474 = vst [vmem:[#allocation16_spill] sm:$0xff] %v4233_v63  ;;  %3412 = vmatprep.subr.mxu0 %v4111_v16  ;;  %3482 = vmatprep.subr.mxu1 %v786_v47  ;;  %v807_v12 = vand.u32 4294901760, %v806_v52  ;;  %v820_v13 = vsub.f32 %v4195_v45, %v4209_v53  ;;  %v4255_v25 = vsub.f32 %v270_v60, %v4233_v63  ;;  %vm2411_vm2 = vcmask 39936   ;;  %p3930_p12 = scmp.ne.s32.totalorder %s3030_s7, %s3929_s27 }
  0x23   : > { %5475 = vst [vmem:[#allocation17_spill] sm:$0xff] %v4240_v2  ;;  %5476 = vst [vmem:[#allocation18_spill] sm:$0xff] %v4242_v6  ;;  %3413 = vmatpush3.msra.mxu0 %v4111_v16  ;;  %3483 = vmatpush3.msra.mxu1 %v786_v47  ;;  %v4258_v30 = vsub.f32 %v255_v43, %v4211_v54  ;;  %v827_v31 = vsub.f32 %v4202_v50, %v4221_v58  ;;  %v4269_v35 = vand.u32 4294901760, %v4245_v7  ;;  %v227_v58 = vld [vmem:[%s4180_s13 + $0x30] sm:$0xff] }
  0x24   : > { %5477 = vst [vmem:[#allocation19_spill] sm:$0xff] %v4255_v25  ;;  %3414 = vmatprep.subr.mxu0 %v4136_v24  ;;  %3484 = vmatprep.subr.mxu1 %v793_v48  ;;  %v834_v32 = vsub.f32 %v4217_v56, %v4231_v62  ;;  %v4266_v33 = vsub.f32 %v273_v0, %v4242_v6  ;;  %v5364_v40 = vand.u32 4294901760, %v4255_v25  ;;  %v276_v43 = vsel %vm268_vm0, %v223_v8, 0  ;;  %v225_v8 = vld [vmem:[%s4180_s13 + $0x20] sm:$0xff]  ;;  %p3931_p13 = pnand %p3930_p12, %p4057_p5 }
  0x25   : > { %5479 = vst [vmem:[#allocation21_spill] sm:$0xff] %v4269_v35  ;;  %3415 = vmatpush3.msra.mxu0 %v4136_v24  ;;  %3485 = vmatpush3.msra.mxu1 %v793_v48  ;;  %v841_v39 = vsub.f32 %v4224_v59, %v4240_v2  ;;  %v4277_v41 = vand.u32 4294901760, %v4258_v30  ;;  %v814_v46 = vand.u32 4294901760, %v813_v61  ;;  %v4281_v47 = vand.u32 4294901760, %v253_v18 }
  0x26   : > { %5478 = vst [vmem:[#allocation20_spill] sm:$0xff] %v4266_v33  ;;  %3416 = vmatprep.subr.mxu0 %v4145_v27  ;;  %3486 = vmatprep.subr.mxu1 %v800_v57  ;;  %v4284_v51 = vand.u32 4294901760, %v276_v43  ;;  %v821_v52 = vand.u32 4294901760, %v820_v13  ;;  %v4290_v60 = vsub.f32 %v4255_v25, %v5364_v40  ;;  %v848_v0 = vsub.f32 %v4245_v7, %v4269_v35  ;;  %v226_v40 = vld [vmem:[%s4180_s13 + $0x28] sm:$0xff]  ;;  %p3932_p0 = pneg %p3931_p13 }
  0x27   : > { %5480 = vst [vmem:[#allocation22_spill] sm:$0xff] %v4277_v41  ;;  %5481 = vst [vmem:[#allocation23_spill] sm:$0xff] %v4281_v47  ;;  %3417 = vmatpush3.msra.mxu0 %v4145_v27  ;;  %3487 = vmatpush3.msra.mxu1 %v800_v57  ;;  %v279_v61 = vsel %vm268_vm0, %v224_v38, 0  ;;  %v828_v48 = vand.u32 4294901760, %v827_v31  ;;  %v4303_v13 = vsub.f32 %v254_v55, %v4237_v1  ;;  %v835_v35 = vand.u32 4294901760, %v834_v32 }
  0x28   : > { %5482 = vst [vmem:[#allocation24_spill] sm:$0xff] %v4284_v51  ;;  %3418 = vmatprep.subr.mxu0 %v4169_v36  ;;  %3488 = vmatprep.subr.mxu1 %v807_v12  ;;  %v4298_v2 = vsub.f32 %v276_v43, %v4284_v51  ;;  %v4300_v57 = vand.u32 4294901760, %v279_v61  ;;  %v4307_v62 = vand.u32 4294901760, %v841_v39  ;;  %v5485_v38 = vand.u32 4294901760, %v4266_v33 }
  0x29   : > { %3419 = vmatpush3.msra.mxu0 %v4169_v36  ;;  %3489 = vmatpush3.msra.mxu1 %v807_v12  ;;  %v855_v43 = vsub.f32 %v4258_v30, %v4277_v41  ;;  %v4323_v32 = vsub.f32 %v253_v18, %v4281_v47  ;;  %v282_v39 = vsel %vm268_vm0, %v225_v8, 0  ;;  %v4328_v41 = vand.u32 4294901760, %v848_v0 }
  0x2a   : > { %5483 = vst [vmem:[#allocation25_spill] sm:$0xff] %v4298_v2  ;;  %5484 = vst [vmem:[#allocation26_spill] sm:$0xff] %v4300_v57  ;;  %v4312_v31 = vsub.f32 %v4266_v33, %v5485_v38  ;;  %3420 = vmatprep.subr.mxu0 %v4185_v42  ;;  %3490 = vmatprep.subr.mxu1 %v814_v46  ;;  %v4320_v12 = vsub.f32 %v279_v61, %v4300_v57  ;;  %v449_v38 = vand.u32 4294901760, %v4290_v60  ;;  %v228_v61 = vld [vmem:[%s4180_s13 + $0x38] sm:$0xff] }
  0x2b   : > { %5487 = vst [vmem:[#allocation28_spill] sm:$0xff] %v4323_v32  ;;  %3421 = vmatpush3.msra.mxu0 %v4185_v42  ;;  %3491 = vmatpush3.msra.mxu1 %v814_v46  ;;  %v4330_v53 = vand.u32 4294901760, %v282_v39  ;;  %v285_v55 = vsel %vm268_vm0, %v226_v40, 0  ;;  %v4337_v8 = vand.u32 4294901760, %v4303_v13  ;;  %v288_v60 = vsel %vm268_vm0, %v227_v58, 0  ;;  %v232_v33 = vld [vmem:[%s4180_s13 + $0x58] sm:$0xff] }
  0x2c   : > { %5486 = vst [vmem:[#allocation27_spill] sm:$0xff] %v4320_v12  ;;  %3422 = vmatprep.subr.mxu0 %v4199_v49  ;;  %3492 = vmatprep.subr.mxu1 %v821_v52  ;;  %v4339_v46 = vand.u32 4294901760, %v285_v55  ;;  %v4343_v0 = vand.u32 4294901760, %v855_v43  ;;  %v5491_v40 = vand.u32 4294901760, %v4298_v2  ;;  %v4351_v18 = vand.u32 4294901760, %v288_v60 }
  0x2d   : > { %5488 = vst [vmem:[#allocation29_spill] sm:$0xff] %v4330_v53  ;;  %5489 = vst [vmem:[#allocation30_spill] sm:$0xff] %v4337_v8  ;;  %3423 = vmatpush3.msra.mxu0 %v4199_v49  ;;  %3493 = vmatpush3.msra.mxu1 %v821_v52  ;;  %v4349_v37 = vsub.f32 %v282_v39, %v4330_v53  ;;  %v459_v58 = vand.u32 4294901760, %v4312_v31  ;;  %v4358_v52 = vand.u32 4294901760, %v4323_v32  ;;  %v291_v39 = vsel %vm268_vm0, %v228_v61, 0 }
  0x2e   : > { %5490 = vst [vmem:[#allocation31_spill] sm:$0xff] %v4339_v46  ;;  %v468_v44 = vsub.f32 %v4298_v2, %v5491_v40  ;;  %5493 = vst [vmem:[#allocation33_spill] sm:$0xff] %v4351_v18  ;;  %3424 = vmatprep.subr.mxu0 %v4211_v54  ;;  %3494 = vmatprep.subr.mxu1 %v828_v48  ;;  %v4361_v43 = vsub.f32 %v285_v55, %v4339_v46  ;;  %v5496_v40 = vand.u32 4294901760, %v4320_v12  ;;  %v231_v2 = vld [vmem:[%s4180_s13 + $0x50] sm:$0xff] }
  0x2f   : > { %5492 = vst [vmem:[#allocation32_spill] sm:$0xff] %v4349_v37  ;;  %5494 = vst [vmem:[#allocation34_spill] sm:$0xff] %v4358_v52  ;;  %3425 = vmatpush3.msra.mxu0 %v4211_v54  ;;  %3495 = vmatpush3.msra.mxu1 %v828_v48  ;;  %v5399_v22 = vand.u32 4294901760, %v4349_v37  ;;  %v4370_v21 = vsub.f32 %v288_v60, %v4351_v18  ;;  %v4372_v31 = vand.u32 4294901760, %v291_v39  ;;  %v294_v61 = vsel %vm268_vm0, %v229_v28, 0 }
  0x30   : > { %5495 = vst [vmem:[#allocation35_spill] sm:$0xff] %v4361_v43  ;;  %v478_v23 = vsub.f32 %v4320_v12, %v5496_v40  ;;  %3426 = vmatprep.subr.mxu0 %v4237_v1  ;;  %3496 = vmatprep.subr.mxu1 %v835_v35  ;;  %v862_v55 = vsub.f32 %v4303_v13, %v4337_v8  ;;  %v297_v40 = vsel %vm268_vm0, %v230_v26, 0  ;;  %v469_v60 = vand.u32 4294901760, %v468_v44 }
  0x31   : > { %5497 = vst [vmem:[#allocation36_spill] sm:$0xff] %v4370_v21  ;;  %5498 = vst [vmem:[#allocation37_spill] sm:$0xff] %v4372_v31  ;;  %3427 = vmatpush3.msra.mxu0 %v4237_v1  ;;  %3497 = vmatpush3.msra.mxu1 %v835_v35  ;;  %v488_v12 = vsub.f32 %v4349_v37, %v5399_v22  ;;  %v4387_v25 = vsub.f32 %v291_v39, %v4372_v31  ;;  %v4389_v54 = vand.u32 4294901760, %v294_v61  ;;  %v233_v22 = vld [vmem:[%s4180_s13 + $0x60] sm:$0xff] }
  0x32   : > { %3428 = vmatprep.subr.mxu0 %v4281_v47  ;;  %3498 = vmatprep.subr.mxu1 %v4307_v62  ;;  %v4394_v26 = vand.u32 4294901760, %v297_v40  ;;  %v300_v44 = vsel %vm268_vm0, %v231_v2, 0  ;;  %v303_v35 = vsel %vm268_vm0, %v232_v33, 0  ;;  %v479_v39 = vand.u32 4294901760, %v478_v23 }
  0x33   : > { %5499 = vst [vmem:[#allocation38_spill] sm:$0xff] %v4389_v54  ;;  %3429 = vmatpush3.msra.mxu0 %v4281_v47  ;;  %3430 = vmatprep.mubr.f32.mxu0 %v449_v38  ;;  %v869_v48 = vsub.f32 %v4323_v32, %v4358_v52  ;;  %v5501_v8 = vand.u32 4294901760, %v4361_v43  ;;  %v4406_v37 = vsub.f32 %v294_v61, %v4389_v54  ;;  %v4413_v23 = vand.u32 4294901760, %v300_v44  ;;  %v234_v52 = vld [vmem:[%s4180_s13 + $0x68] sm:$0xff]  ;;  %v235_v47 = vld [vmem:[%s4180_s13 + $0x70] sm:$0xff] }
  0x34   : > { %5500 = vst [vmem:[#allocation39_spill] sm:$0xff] %v4394_v26  ;;  %3499 = vmatpush3.msra.mxu1 %v4307_v62  ;;  %3431 = vmatmul.mubr.f32.vlgmr.msra.gmra.mxu0 %v459_v58  ;;  %v4411_v33 = vsub.f32 %v297_v40, %v4394_v26  ;;  %v4415_v38 = vand.u32 4294901760, %v303_v35  ;;  %v489_v61 = vand.u32 4294901760, %v488_v12  ;;  %v306_v58 = vsel %vm268_vm0, %v233_v22, 0 }
  0x35   : > { %v498_v28 = vsub.f32 %v4361_v43, %v5501_v8  ;;  %5502 = vst [vmem:[#allocation40_spill] sm:$0xff] %v4406_v37  ;;  %5503 = vst [vmem:[#allocation41_spill] sm:$0xff] %v4413_v23  ;;  %3500 = vmatprep.subr.mxu1 %v4328_v41  ;;  %3433 = vmatprep.mubr.f32.mxu0 %v469_v60  ;;  %v863_v8 = vand.u32 4294901760, %v862_v55  ;;  %v5414_v62 = vand.u32 4294901760, %v4406_v37  ;;  %v5505_v40 = vand.u32 4294901760, %v4370_v21  ;;  %v236_v55 = vld [vmem:[%s4180_s13 + $0x78] sm:$0xff] }
  0x36   : > { %5504 = vst [vmem:[#allocation42_spill] sm:$0xff] %v4415_v38  ;;  %3501 = vmatpush3.msra.mxu1 %v4328_v41  ;;  %3556 = vmatprep.subr.mxu0 %v4106_v14  ;;  %v4428_v43 = vsub.f32 %v300_v44, %v4413_v23  ;;  %v4430_v32 = vand.u32 4294901760, %v306_v58  ;;  %v870_v12 = vand.u32 4294901760, %v869_v48  ;;  %v309_v41 = vsel %vm268_vm0, %v234_v52, 0  ;;  %v237_v52 = vld [vmem:[%s4180_s13 + $0x80] sm:$0xff] }
  0x37   : > { %v508_v2 = vsub.f32 %v4370_v21, %v5505_v40  ;;  %3502 = vmatprep.subr.mxu1 %v4343_v0  ;;  %3508 = vmatprep.mubr.f32.mxu1 %v4233_v63  ;;  %v499_v22 = vand.u32 4294901760, %v498_v28  ;;  %v312_v60 = vsel %vm268_vm0, %v235_v47, 0  ;;  %v5507_v40 = vand.u32 4294901760, %v4387_v25  ;;  %v239_v63 = vld [vmem:[%s4180_s13 + $0x90] sm:$0xff] }
  0x38   : > { %5506 = vst [vmem:[#allocation43_spill] sm:$0xff] %v4430_v32  ;;  %3503 = vmatpush3.msra.mxu1 %v4343_v0  ;;  %3434 = vmatmul.mubr.f32.gmra.mxu0 %v479_v39  ;;  %v528_v21 = vsub.f32 %v4406_v37, %v5414_v62  ;;  %v4446_v28 = vsub.f32 %v303_v35, %v4415_v38  ;;  %v4453_v39 = vand.u32 4294901760, %v309_v41  ;;  %v4457_v48 = vand.u32 4294901760, %v312_v60  ;;  %v238_v35 = vld [vmem:[%s4180_s13 + $0x88] sm:$0xff] }
  0x39   : > { %v518_v44 = vsub.f32 %v4387_v25, %v5507_v40  ;;  %3504 = vmatprep.subr.mxu1 %v863_v8  ;;  %3436 = vmatprep.mubr.f32.mxu0 %v489_v61  ;;  %v4451_v0 = vsub.f32 %v306_v58, %v4430_v32  ;;  %v315_v40 = vsel %vm268_vm0, %v236_v55, 0  ;;  %v509_v62 = vand.u32 4294901760, %v508_v2  ;;  %v240_v55 = vld [vmem:[%s4180_s13 + $0x98] sm:$0xff] }
  0x3a   : > { %5508 = vst [vmem:[#allocation44_spill] sm:$0xff] %v4446_v28  ;;  %5510 = vst [vmem:[#allocation46_spill] sm:$0xff] %v4453_v39  ;;  %3505 = vmatpush3.msra.mxu1 %v863_v8  ;;  %3557 = vmatpush3.msra.mxu0 %v4106_v14  ;;  %v4462_v61 = vsub.f32 %v309_v41, %v4453_v39  ;;  %v4464_v58 = vand.u32 4294901760, %v315_v40  ;;  %v318_v47 = vsel %vm268_vm0, %v237_v52, 0  ;;  %v5512_v14 = vand.u32 4294901760, %v4411_v33 }
  0x3b   : > { %5509 = vst [vmem:[#allocation45_spill] sm:$0xff] %v4451_v0  ;;  %5511 = vst [vmem:[#allocation47_spill] sm:$0xff] %v4457_v48  ;;  %3506 = vmatprep.subr.mxu1 %v870_v12  ;;  %3558 = vmatprep.subr.mxu0 %v4109_v15  ;;  %v519_v8 = vand.u32 4294901760, %v518_v44  ;;  %v529_v41 = vand.u32 4294901760, %v528_v21  ;;  %v5513_v37 = vand.u32 4294901760, %v4428_v43  ;;  %v321_v44 = vsel %vm268_vm0, %v238_v35, 0 }
  0x3c   : > { %3507 = vmatpush3.msra.mxu1 %v870_v12  ;;  %3437 = vmatmul.mubr.f32.gmra.mxu0 %v499_v22  ;;  %v538_v2 = vsub.f32 %v4411_v33, %v5512_v14  ;;  %v4481_v52 = vsub.f32 %v312_v60, %v4457_v48  ;;  %v4483_v14 = vand.u32 4294901760, %v318_v47  ;;  %v324_v35 = vsel %vm268_vm0, %v239_v63, 0  ;;  %v241_v22 = vld [vmem:[%s4180_s13 + $0xa0] sm:$0xff] }
  0x3d   : > { %3509 = vmatmul.mubr.f32.vlgmr.msra.gmra.mxu1 %v4242_v6  ;;  %3634 = vmatprep.subr.mxu1 %v4077_v3  ;;  %v548_v12 = vsub.f32 %v4428_v43, %v5513_v37  ;;  %v4490_v37 = vsub.f32 %v315_v40, %v4464_v58  ;;  %v5515_v60 = vand.u32 4294901760, %v4446_v28  ;;  %v5516_v40 = vand.u32 4294901760, %v4451_v0 }
  0x3e   : > { %3635 = vmatpush3.msra.mxu1 %v4077_v3  ;;  %3439 = vmatprep.mubr.f32.mxu0 %v509_v62  ;;  %v539_v62 = vand.u32 4294901760, %v538_v2  ;;  %v4511_v21 = vand.u32 4294901760, %v324_v35  ;;  %v243_v2 = vld [vmem:[%s4180_s13 + $0xb0] sm:$0xff] }
  0x3f   : > { %3511 = vmatprep.mubr.f32.mxu1 %v4284_v51  ;;  %3559 = vmatpush3.msra.mxu0 %v4109_v15  ;;  %5514 = vst [vmem:[#allocation48_spill] sm:$0xff] %v4490_v37  ;;  %v558_v6 = vsub.f32 %v4446_v28, %v5515_v60  ;;  %v4498_v51 = vand.u32 4294901760, %v321_v44  ;;  %v549_v15 = vand.u32 4294901760, %v548_v12  ;;  %v568_v63 = vsub.f32 %v4451_v0, %v5516_v40  ;;  %v242_v12 = vld [vmem:[%s4180_s13 + $0xa8] sm:$0xff] }
  0x40   : > { %3440 = vmatmul.mubr.f32.gmra.mxu0 %v519_v8  ;;  %3636 = vmatprep.subr.mxu1 %v4079_v4  ;;  %v327_v8 = vsel %vm268_vm0, %v240_v55, 0  ;;  %v4509_v60 = vsub.f32 %v318_v47, %v4483_v14  ;;  %v5517_v55 = vand.u32 4294901760, %v4462_v61 }
  0x41   : > { %3512 = vmatmul.mubr.f32.gmra.mxu1 %v4300_v57  ;;  %3442 = vmatprep.mubr.f32.mxu0 %v529_v41  ;;  %v330_v41 = vsel %vm268_vm0, %v241_v22, 0  ;;  %v559_v47 = vand.u32 4294901760, %v558_v6  ;;  %v4524_v57 = vsub.f32 %v321_v44, %v4498_v51  ;;  %v4526_v22 = vand.u32 4294901760, %v327_v8 }
  0x42   : > { %3637 = vmatpush3.msra.mxu1 %v4079_v4  ;;  %3514 = vmatprep.mubr.f32.mxu1 %v4330_v53  ;;  %v578_v40 = vsub.f32 %v4462_v61, %v5517_v55  ;;  %v569_v0 = vand.u32 4294901760, %v568_v63  ;;  %v4530_v28 = vand.u32 4294901760, %v330_v41  ;;  %v333_v55 = vsel %vm268_vm0, %v242_v12, 0  ;;  %v244_v53 = vld [vmem:[%s4180_s13 + $0xb8] sm:$0xff] }
  0x43   : > { %3560 = vmatprep.subr.mxu0 %v4114_v17  ;;  %3638 = vmatprep.subr.mxu1 %v4081_v5  ;;  %5518 = vst [vmem:[#allocation49_spill] sm:$0xff] %v4524_v57  ;;  %v5519_v6 = vand.u32 4294901760, %v4481_v52 }
  0x44   : > { %3443 = vmatmul.mubr.f32.gmra.mxu0 %v539_v62  ;;  %3639 = vmatpush3.msra.mxu1 %v4081_v5  ;;  %v579_v63 = vand.u32 4294901760, %v578_v40  ;;  %v4553_v62 = vand.u32 4294901760, %v333_v55  ;;  %v4560_v40 = vsub.f32 %v330_v41, %v4530_v28 }
  0x45   : > { %3515 = vmatmul.mubr.f32.gmra.mxu1 %v4339_v46  ;;  %3561 = vmatpush3.msra.mxu0 %v4114_v17  ;;  %v588_v44 = vsub.f32 %v4481_v52, %v5519_v6  ;;  %v4540_v46 = vsub.f32 %v324_v35, %v4511_v21  ;;  %v336_v17 = vsel %vm268_vm0, %v243_v2, 0  ;;  %v4551_v35 = vsub.f32 %v327_v8, %v4526_v22 }
  0x46   : > { %3445 = vmatprep.mubr.f32.mxu0 %v549_v15  ;;  %3517 = vmatprep.mubr.f32.mxu1 %v4351_v18  ;;  %v5520_v15 = vand.u32 4294901760, %v4490_v37  ;;  %v339_v2 = vsel %vm268_vm0, %v244_v53, 0  ;;  %v245_v18 = vld [vmem:[%s4180_s13 + $0xc0] sm:$0xff] }
  0x47   : > { %3562 = vmatprep.subr.mxu0 %v4121_v19  ;;  %3640 = vmatprep.subr.mxu1 %v4092_v9  ;;  %5521 = vst [vmem:[#allocation50_spill] sm:$0xff] %v4551_v35  ;;  %v589_v8 = vand.u32 4294901760, %v588_v44  ;;  %v342_v41 = vsel %vm268_vm0, %v245_v18, 0  ;;  %v5523_v44 = vand.u32 4294901760, %v4524_v57 }
  0x48   : > { %v598_v12 = vsub.f32 %v4490_v37, %v5520_v15  ;;  %3446 = vmatmul.mubr.f32.gmra.mxu0 %v559_v47  ;;  %3641 = vmatpush3.msra.mxu1 %v4092_v9  ;;  %v4562_v47 = vand.u32 4294901760, %v336_v17  ;;  %v5522_v15 = vand.u32 4294901760, %v4509_v60  ;;  %v246_v37 = vld [vmem:[%s4180_s13 + $0xc8] sm:$0xff] }
  0x49   : > { %3518 = vmatmul.mubr.f32.gmra.mxu1 %v4372_v31  ;;  %3563 = vmatpush3.msra.mxu0 %v4121_v19  ;;  %v4572_v19 = vand.u32 4294901760, %v339_v2  ;;  %v247_v31 = vld [vmem:[%s4180_s13 + $0xd0] sm:$0xff] }
  0x4a   : > { %3448 = vmatprep.mubr.f32.mxu0 %v569_v0  ;;  %3520 = vmatprep.mubr.f32.mxu1 %v4389_v54  ;;  %v608_v6 = vsub.f32 %v4509_v60, %v5522_v15  ;;  %v599_v0 = vand.u32 4294901760, %v598_v12  ;;  %v618_v15 = vsub.f32 %v4524_v57, %v5523_v44  ;;  %v4581_v54 = vsub.f32 %v333_v55, %v4553_v62 }
  0x4b   : > { %3564 = vmatprep.subr.mxu0 %v4124_v20  ;;  %3642 = vmatprep.subr.mxu1 %v4094_v10  ;;  %v345_v12 = vsel %vm268_vm0, %v246_v37, 0  ;;  %v5525_v55 = vand.u32 4294901760, %v4540_v46  ;;  %v4595_v57 = vand.u32 4294901760, %v342_v41  ;;  %v348_v37 = vsel %vm268_vm0, %v247_v31, 0 }
  0x4c   : > { %3449 = vmatmul.mubr.f32.gmra.mxu0 %v579_v63  ;;  %3643 = vmatpush3.msra.mxu1 %v4094_v10  ;;  %5524 = vst [vmem:[#allocation51_spill] sm:$0xff] %v4581_v54  ;;  %v4588_v63 = vsub.f32 %v336_v17, %v4562_v47  ;;  %v609_v44 = vand.u32 4294901760, %v608_v6  ;;  %v619_v17 = vand.u32 4294901760, %v618_v15  ;;  %v5526_v6 = vand.u32 4294901760, %v4551_v35 }
  0x4d   : > { %3521 = vmatmul.mubr.f32.gmra.mxu1 %v4394_v26  ;;  %3565 = vmatpush3.msra.mxu0 %v4124_v20  ;;  %v628_v53 = vsub.f32 %v4540_v46, %v5525_v55  ;;  %v248_v26 = vld [vmem:[%s4180_s13 + $0xd8] sm:$0xff]  ;;  %v4601_v20 = vsub.f32 %v339_v2, %v4572_v19  ;;  %v4609_v18 = vand.u32 4294901760, %v345_v12  ;;  %v5527_v31 = vand.u32 4294901760, %v4560_v40 }
  0x4e   : > { %3451 = vmatprep.mubr.f32.mxu0 %v589_v8  ;;  %3523 = vmatprep.mubr.f32.mxu1 %v4413_v23  ;;  %v638_v8 = vsub.f32 %v4551_v35, %v5526_v6  ;;  %v249_v23 = vld [vmem:[%s4180_s13 + $0xe0] sm:$0xff]  ;;  %v351_v15 = vsel %vm268_vm0, %v248_v26, 0  ;;  %v4621_v55 = vsub.f32 %v342_v41, %v4595_v57  ;;  %v4623_v35 = vand.u32 4294901760, %v348_v37 }
  0x4f   : > { %3566 = vmatprep.subr.mxu0 %v4151_v29  ;;  %3644 = vmatprep.subr.mxu1 %v4096_v11  ;;  %v648_v2 = vsub.f32 %v4560_v40, %v5527_v31  ;;  %v629_v6 = vand.u32 4294901760, %v628_v53  ;;  %v354_v31 = vsel %vm268_vm0, %v249_v23, 0  ;;  %v5528_v53 = vand.u32 4294901760, %v4581_v54 }
  0x50   : > { %3452 = vmatmul.mubr.f32.gmra.mxu0 %v599_v0  ;;  %3645 = vmatpush3.msra.mxu1 %v4096_v11  ;;  %v251_v0 = vld [vmem:[%s4180_s13 + $0xf0] sm:$0xff]  ;;  %v639_v26 = vand.u32 4294901760, %v638_v8 }
  0x51   : > { %3524 = vmatmul.mubr.f32.gmra.mxu1 %v4415_v38  ;;  %3567 = vmatpush3.msra.mxu0 %v4151_v29  ;;  %v250_v38 = vld [vmem:[%s4180_s13 + $0xe8] sm:$0xff]  ;;  %v658_v41 = vsub.f32 %v4581_v54, %v5528_v53  ;;  %v649_v23 = vand.u32 4294901760, %v648_v2  ;;  %v4651_v54 = vand.u32 4294901760, %v354_v31  ;;  %v5530_v2 = vand.u32 4294901760, %v4601_v20 }
  0x52   : > { %3454 = vmatprep.mubr.f32.mxu0 %v609_v44  ;;  %3526 = vmatprep.mubr.f32.mxu1 %v4430_v32  ;;  %v4636_v44 = vsub.f32 %v345_v12, %v4609_v18  ;;  %v4638_v32 = vand.u32 4294901760, %v351_v15  ;;  %v357_v8 = vsel %vm268_vm0, %v250_v38, 0  ;;  %v4649_v12 = vsub.f32 %v348_v37, %v4623_v35 }
  0x53   : > { %3568 = vmatprep.subr.mxu0 %v4164_v34  ;;  %3646 = vmatprep.subr.mxu1 %v4111_v16  ;;  %v678_v38 = vsub.f32 %v4601_v20, %v5530_v2  ;;  %v4665_v53 = vand.u32 4294901760, %v357_v8  ;;  %v4678_v37 = vsub.f32 %v354_v31, %v4651_v54 }
  0x54   : > { %3455 = vmatmul.mubr.f32.gmra.mxu0 %v619_v17  ;;  %3647 = vmatpush3.msra.mxu1 %v4111_v16  ;;  %v5529_v17 = vand.u32 4294901760, %v4588_v63 }
  0x55   : > { %3527 = vmatmul.mubr.f32.gmra.mxu1 %v4453_v39  ;;  %3569 = vmatpush3.msra.mxu0 %v4164_v34  ;;  %v360_v39 = vsel %vm268_vm0, %v251_v0, 0  ;;  %v252_v34 = vld [vmem:[%s4180_s13 + $0xf8] sm:$0xff]  ;;  %s3117_s13 = sshll.u32 %s4040_s19, 7  ;;  %s3993_s19 = smov [#allocation2]  }
  0x56   : > { %v668_v29 = vsub.f32 %v4588_v63, %v5529_v17  ;;  %3457 = vmatprep.mubr.f32.mxu0 %v629_v6  ;;  %3529 = vmatprep.mubr.f32.mxu1 %v4457_v48  ;;  %v659_v6 = vand.u32 4294901760, %v658_v41  ;;  %v4663_v17 = vsub.f32 %v351_v15, %v4638_v32  ;;  %v4669_v0 = vand.u32 4294901760, %v360_v39  ;;  %s3027_s22 = scalar_lea.hbm %s5361_s4, %s3117_s13  ;;  %s3933_s28 = sshll.u32 %s3993_s19, 4  ;;  %s3934_s28 = int_to_ptr.vmem [resolvable:$false] %s3933_s28 }
  0x57   : > { %3570 = vmatprep.subr.mxu0 %v4195_v45  ;;  %3648 = vmatprep.subr.mxu1 %v4136_v24  ;;  %v363_v48 = vsel %vm268_vm0, %v252_v34, 0  ;;  %v5531_v41 = vand.u32 4294901760, %v4621_v55  ;;  %s3935_s29 = scalar_lea.vmem %s3934_s28, 256  ;;  %p3936_p1 = scmp.lt.s32.totalorder %s3030_s7, %s3934_s28 }
  0x58   : > { %3458 = vmatmul.mubr.f32.gmra.mxu0 %v639_v26  ;;  %3649 = vmatpush3.msra.mxu1 %v4136_v24  ;;  %v669_v26 = vand.u32 4294901760, %v668_v29  ;;  %v4690_v15 = vand.u32 4294901760, %v363_v48  ;;  %v4695_v31 = vsub.f32 %v360_v39, %v4669_v0  ;;  %p3937_p2 = scmp.lt.s32.totalorder %s3935_s29, %s3929_s27 }
  0x59   : > { %3530 = vmatmul.mubr.f32.gmra.mxu1 %v4464_v58  ;;  %3571 = vmatpush3.msra.mxu0 %v4195_v45  ;;  %v688_v2 = vsub.f32 %v4621_v55, %v5531_v41  ;;  %v679_v45 = vand.u32 4294901760, %v678_v38  ;;  %v4688_v41 = vsub.f32 %v357_v8, %v4665_v53  ;;  %v727_v8 = vand.u32 4294901760, %v4678_v37 }
  0x5a   : > { %3460 = vmatprep.mubr.f32.mxu0 %v649_v23  ;;  %3532 = vmatprep.mubr.f32.mxu1 %v4483_v14  ;;  %v5532_v23 = vand.u32 4294901760, %v4636_v44  ;;  %p3938_p3 = por %p3937_p2, %p3936_p1 }
  0x5b   : > { %3572 = vmatprep.subr.mxu0 %v4202_v50  ;;  %3650 = vmatprep.subr.mxu1 %v4145_v27  ;;  %v689_v38 = vand.u32 4294901760, %v688_v2  ;;  %v4710_v2 = vsub.f32 %v363_v48, %v4690_v15 }
  0x5c   : > { %3461 = vmatmul.mubr.f32.gmra.mxu0 %v659_v6  ;;  %3651 = vmatpush3.msra.mxu1 %v4145_v27  ;;  %v698_v29 = vsub.f32 %v4636_v44, %v5532_v23  ;;  %v5533_v6 = vand.u32 4294901760, %v4649_v12  ;;  %p3939_p4 = pnand %p3938_p3, %p3932_p0 }
  0x5d   : > { %3533 = vmatmul.mubr.f32.gmra.mxu1 %v4498_v51  ;;  %3573 = vmatpush3.msra.mxu0 %v4202_v50  ;;  %v5534_v50 = vand.u32 4294901760, %v4663_v17 }
  0x5e   : > { %3463 = vmatprep.mubr.f32.mxu0 %v669_v26  ;;  %3535 = vmatprep.mubr.f32.mxu1 %v4511_v21  ;;  %v708_v23 = vsub.f32 %v4649_v12, %v5533_v6  ;;  %v699_v34 = vand.u32 4294901760, %v698_v29  ;;  %v737_v26 = vand.u32 4294901760, %v4688_v41  ;;  %v5460_v6 = vand.u32 4294901760, %v4695_v31 }
  0x5f   : > { %3574 = vmatprep.subr.mxu0 %v4217_v56  ;;  %3652 = vmatprep.subr.mxu1 %v4169_v36  ;;  %v718_v39 = vsub.f32 %v4663_v17, %v5534_v50  ;;  %v728_v29 = vsub.f32 %v4678_v37, %v727_v8 }
  0x60   : > { %3464 = vmatmul.mubr.f32.gmra.mxu0 %v679_v45  ;;  %3653 = vmatpush3.msra.mxu1 %v4169_v36  ;;  %v709_v45 = vand.u32 4294901760, %v708_v23  ;;  %v748_v23 = vsub.f32 %v4695_v31, %v5460_v6 }
  0x61   : > { %3536 = vmatmul.mubr.f32.gmra.mxu1 %v4526_v22  ;;  %3575 = vmatpush3.msra.mxu0 %v4217_v56  ;;  %v719_v48 = vand.u32 4294901760, %v718_v39  ;;  %v738_v56 = vsub.f32 %v4688_v41, %v737_v26 }
  0x62   : > { %3466 = vmatprep.mubr.f32.mxu0 %v689_v38  ;;  %3538 = vmatprep.mubr.f32.mxu1 %v4530_v28  ;;  %v5459_v38 = vand.u32 4294901760, %v4710_v2  ;;  %v749_v39 = vand.u32 4294901760, %v748_v23  ;;  %v5540_v23 = vld [vmem:[#allocation25_spill] sm:$0xff] }
  0x63   : > { %3576 = vmatprep.subr.mxu0 %v4224_v59  ;;  %3654 = vmatprep.subr.mxu1 %v4185_v42  ;;  %v739_v50 = vand.u32 4294901760, %v738_v56  ;;  %v5539_v56 = vld [vmem:[#allocation23_spill] sm:$0xff]  ;;  %v5549_v6 = vand.u32 4294901760, %v5540_v23 }
  0x64   : > { %3467 = vmatmul.mubr.f32.gmra.mxu0 %v699_v34  ;;  %3655 = vmatpush3.msra.mxu1 %v4185_v42  ;;  %v729_v34 = vand.u32 4294901760, %v728_v29 }
  0x65   : > { %3539 = vmatmul.mubr.f32.gmra.mxu1 %v4553_v62  ;;  %3577 = vmatpush3.msra.mxu0 %v4224_v59  ;;  %v758_v59 = vsub.f32 %v4710_v2, %v5459_v38  ;;  %v5548_v38 = vld [vmem:[#allocation36_spill] sm:$0xff] }
  0x66   : > { %3469 = vmatprep.mubr.f32.mxu0 %v709_v45  ;;  %3541 = vmatprep.mubr.f32.mxu1 %v4562_v47  ;;  %v5535_v45 = vld [vmem:[#allocation13_spill] sm:$0xff] }
  0x67   : > { %3578 = vmatprep.subr.mxu0 %v4245_v7  ;;  %3656 = vmatprep.subr.mxu1 %v4199_v49  ;;  %v759_v29 = vand.u32 4294901760, %v758_v59 }
  0x68   : > { %3470 = vmatmul.mubr.f32.gmra.mxu0 %v719_v48  ;;  %3657 = vmatpush3.msra.mxu1 %v4199_v49  ;;  %v5537_v48 = vld [vmem:[#allocation19_spill] sm:$0xff] }
  0x69   : > { %3542 = vmatmul.mubr.f32.gmra.mxu1 %v4572_v19  ;;  %3579 = vmatpush3.msra.mxu0 %v4245_v7  ;;  %v5536_v7 = vld [vmem:[#allocation28_spill] sm:$0xff]  ;;  %v5544_v59 = vand.u32 4294901760, %v5537_v48 }
  0x6a   : > { %3472 = vmatprep.mubr.f32.mxu0 %v729_v34  ;;  %3544 = vmatprep.mubr.f32.mxu1 %v4595_v57  ;;  %v5542_v34 = vld [vmem:[#allocation27_spill] sm:$0xff] }
  0x6b   : > { %3580 = vmatprep.subr.mxu0 %v4258_v30  ;;  %3658 = vmatprep.subr.mxu1 %v5535_v45 }
  0x6c   : > { %3473 = vmatmul.mubr.f32.gmra.mxu0 %v739_v50  ;;  %3659 = vmatpush3.msra.mxu1 %v5535_v45  ;;  %v5543_v50 = vld [vmem:[#allocation32_spill] sm:$0xff] }
  0x6d   : > { %3545 = vmatmul.mubr.f32.gmra.mxu1 %v4609_v18  ;;  %3475 = vmatprep.mubr.f32.mxu0 %v749_v39  ;;  %v5545_v39 = vld [vmem:[#allocation6_spill] sm:$0xff] }
  0x6e   : > { %3547 = vmatprep.mubr.f32.mxu1 %v4623_v35  ;;  %3581 = vmatpush3.msra.mxu0 %v4258_v30  ;;  %v5538_v30 = vld [vmem:[#allocation20_spill] sm:$0xff] }
  0x6f   : > { %3582 = vmatprep.subr.mxu0 %v4303_v13  ;;  %3660 = vmatprep.subr.mxu1 %v4237_v1 }
  0x70   : > { %3476 = vmatmul.mubr.f32.gmra.mxu0 %v759_v29  ;;  %3661 = vmatpush3.msra.mxu1 %v4237_v1  ;;  %v5546_v29 = vld [vmem:[#allocation35_spill] sm:$0xff] }
  0x71   : > { %3548 = vmatmul.mubr.f32.gmra.mxu1 %v4638_v32  ;;  %3583 = vmatpush3.msra.mxu0 %v4303_v13  ;;  %v5541_v13 = vld [vmem:[#allocation5_spill] sm:$0xff] }
  0x72   : > { %3584 = vmatprep.subr.mxu0 %v5536_v7  ;;  %3550 = vmatprep.mubr.f32.mxu1 %v4651_v54 }
  0x73   : > { %3585 = vmatpush3.msra.mxu0 %v5536_v7  ;;  %3586 = vmatprep.mubr.f32.mxu0 %v5537_v48  ;;  %v5547_v7 = vand.u32 4294901760, %v5538_v30  ;;  %v5550_v48 = vand.u32 4294901760, %v5542_v34 }
  0x74   : > { %3587 = vmatmul.mubr.f32.vlgmr.msra.gmra.mxu0 %v5538_v30  ;;  %3662 = vmatprep.subr.mxu1 %v5539_v56  ;;  %v5551_v30 = vld [vmem:[#allocation40_spill] sm:$0xff] }
  0x75   : > { %3551 = vmatmul.mubr.f32.gmra.mxu1 %v4665_v53  ;;  %3589 = vmatprep.mubr.f32.mxu0 %v5540_v23  ;;  %v5556_v23 = vld [vmem:[#allocation8_spill] sm:$0xff] }
  0x76   : > { %3553 = vmatprep.mubr.f32.mxu1 %v4669_v0  ;;  %3663 = vmatpush3.msra.mxu1 %v5539_v56 }
  0x77   : > { %3712 = vmatprep.subr.mxu0 %v5541_v13  ;;  %3790 = vmatprep.subr.mxu1 %v4077_v3 }
  0x78   : > { %3590 = vmatmul.mubr.f32.gmra.mxu0 %v5542_v34  ;;  %v5557_v34 = vld [vmem:[#allocation44_spill] sm:$0xff] }
  0x79   : > { %3554 = vmatmul.mubr.f32.gmra.mxu1 %v4690_v15  ;;  %3592 = vmatprep.mubr.f32.mxu0 %v5543_v50 }
  0x7a   : > { %3664 = vmatprep.mubr.f32.mxu1 %v5544_v59  ;;  %3713 = vmatpush3.msra.mxu0 %v5541_v13  ;;  %v5552_v13 = vand.u32 4294901760, %v5543_v50  ;;  %v5559_v50 = vld [vmem:[#allocation45_spill] sm:$0xff]  ;;  %v5560_v59 = vand.u32 4294901760, %v5551_v30 }
  0x7b   : > { %3714 = vmatprep.subr.mxu0 %v5545_v39 }
  0x7c   : > { %3593 = vmatmul.mubr.f32.gmra.mxu0 %v5546_v29 }
  0x7d   : > { %3665 = vmatmul.mubr.f32.vlgmr.msra.gmra.mxu1 %v5547_v7  ;;  %3595 = vmatprep.mubr.f32.mxu0 %v5548_v38  ;;  %v5569_v7 = vld [vmem:[#allocation49_spill] sm:$0xff] }
  0x7e   : > { %3791 = vmatpush3.msra.mxu1 %v4077_v3  ;;  %3667 = vmatprep.mubr.f32.mxu1 %v5549_v6  ;;  %v5553_v3 = vld [vmem:[#allocation7_spill] sm:$0xff]  ;;  %v5555_v6 = vand.u32 4294901760, %v5548_v38  ;;  %v5561_v38 = vld [vmem:[#allocation9_spill] sm:$0xff] }
  0x7f   : > { %3715 = vmatpush3.msra.mxu0 %v5545_v39  ;;  %3792 = vmatprep.subr.mxu1 %v4079_v4  ;;  %v5564_v39 = vld [vmem:[#allocation10_spill] sm:$0xff] }
  0x80   : > { %3596 = vmatmul.mubr.f32.gmra.mxu0 %v4387_v25  ;;  %3793 = vmatpush3.msra.mxu1 %v4079_v4  ;;  %v5554_v4 = vand.u32 4294901760, %v5546_v29  ;;  %v5565_v29 = vld [vmem:[#allocation48_spill] sm:$0xff] }
  0x81   : > { %3668 = vmatmul.mubr.f32.gmra.mxu1 %v5550_v48  ;;  %3598 = vmatprep.mubr.f32.mxu0 %v5551_v30  ;;  %v5571_v48 = vand.u32 4294901760, %v4481_v52  ;;  %v5572_v30 = vld [vmem:[#allocation12_spill] sm:$0xff] }
  0x82   : > { %3670 = vmatprep.mubr.f32.mxu1 %v5552_v13  ;;  %3716 = vmatprep.subr.mxu0 %v5553_v3  ;;  %v5573_v13 = vld [vmem:[#allocation50_spill] sm:$0xff] }
  0x83   : > { %3717 = vmatpush3.msra.mxu0 %v5553_v3  ;;  %3794 = vmatprep.subr.mxu1 %v4081_v5  ;;  %v5577_v3 = vld [vmem:[#allocation51_spill] sm:$0xff] }
  0x84   : > { %3599 = vmatmul.mubr.f32.gmra.mxu0 %v4411_v33  ;;  %3795 = vmatpush3.msra.mxu1 %v4081_v5  ;;  %v5558_v5 = vand.u32 4294901760, %v4387_v25  ;;  %v5563_v25 = vand.u32 4294901760, %v4428_v43 }
  0x85   : > { %3671 = vmatmul.mubr.f32.gmra.mxu1 %v5554_v4  ;;  %3601 = vmatprep.mubr.f32.mxu0 %v4428_v43  ;;  %v5567_v43 = vand.u32 4294901760, %v5559_v50  ;;  %v5579_v4 = vand.u32 4294901760, %v4540_v46 }
  0x86   : > { %3673 = vmatprep.mubr.f32.mxu1 %v5555_v6  ;;  %3718 = vmatprep.subr.mxu0 %v5556_v23  ;;  %v5580_v6 = vld [vmem:[#allocation15_spill] sm:$0xff] }
  0x87   : > { %3719 = vmatpush3.msra.mxu0 %v5556_v23  ;;  %3796 = vmatprep.subr.mxu1 %v4092_v9  ;;  %v5581_v23 = vand.u32 4294901760, %v5573_v13 }
  0x88   : > { %3602 = vmatmul.mubr.f32.gmra.mxu0 %v5557_v34  ;;  %3797 = vmatpush3.msra.mxu1 %v4092_v9  ;;  %v5562_v9 = vand.u32 4294901760, %v4411_v33  ;;  %v5568_v33 = vld [vmem:[#allocation11_spill] sm:$0xff] }
  0x89   : > { %3674 = vmatmul.mubr.f32.gmra.mxu1 %v5558_v5  ;;  %3604 = vmatprep.mubr.f32.mxu0 %v5559_v50  ;;  %v5584_v50 = vand.u32 4294901760, %v5577_v3 }
  0x8a   : > { %3676 = vmatprep.mubr.f32.mxu1 %v5560_v59  ;;  %3720 = vmatprep.subr.mxu0 %v5561_v38  ;;  %v5586_v59 = vld [vmem:[#allocation21_spill] sm:$0xff] }
  0x8b   : > { %3721 = vmatpush3.msra.mxu0 %v5561_v38  ;;  %3798 = vmatprep.subr.mxu1 %v4094_v10 }
  0x8c   : > { %3605 = vmatmul.mubr.f32.gmra.mxu0 %v4462_v61  ;;  %3799 = vmatpush3.msra.mxu1 %v4094_v10  ;;  %v5566_v10 = vand.u32 4294901760, %v5557_v34  ;;  %v5583_v34 = vld [vmem:[#allocation17_spill] sm:$0xff] }
  0x8d   : > { %3677 = vmatmul.mubr.f32.gmra.mxu1 %v5562_v9  ;;  %3607 = vmatprep.mubr.f32.mxu0 %v4481_v52  ;;  %v5576_v52 = vld [vmem:[#allocation14_spill] sm:$0xff] }
  0x8e   : > { %3679 = vmatprep.mubr.f32.mxu1 %v5563_v25  ;;  %3722 = vmatprep.subr.mxu0 %v5564_v39  ;;  %v5589_v25 = vld [vmem:[#allocation22_spill] sm:$0xff] }
  0x8f   : > { %3723 = vmatpush3.msra.mxu0 %v5564_v39  ;;  %3800 = vmatprep.subr.mxu1 %v4096_v11 }
  0x90   : > { %3608 = vmatmul.mubr.f32.gmra.mxu0 %v5565_v29  ;;  %3801 = vmatpush3.msra.mxu1 %v4096_v11  ;;  %v5570_v11 = vand.u32 4294901760, %v4462_v61  ;;  %v5575_v61 = vand.u32 4294901760, %v4509_v60 }
  0x91   : > { %3680 = vmatmul.mubr.f32.gmra.mxu1 %v5566_v10  ;;  %3610 = vmatprep.mubr.f32.mxu0 %v4509_v60  ;;  %v2410_v60 = vld [vmem:[%s212_s6 + $0x8] sm:$0x1f] }
  0x92   : > { %3682 = vmatprep.mubr.f32.mxu1 %v5567_v43  ;;  %3724 = vmatprep.subr.mxu0 %v5568_v33  ;;  %v5593_v43 = vld [vmem:[#allocation34_spill] sm:$0xff] }
  0x93   : > { %3725 = vmatpush3.msra.mxu0 %v5568_v33  ;;  %3802 = vmatprep.subr.mxu1 %v4111_v16 }
  0x94   : > { %3611 = vmatmul.mubr.f32.gmra.mxu0 %v5569_v7  ;;  %3803 = vmatpush3.msra.mxu1 %v4111_v16  ;;  %v5574_v16 = vand.u32 4294901760, %v5565_v29 }
  0x95   : > { %3683 = vmatmul.mubr.f32.gmra.mxu1 %v5570_v11  ;;  %3613 = vmatprep.mubr.f32.mxu0 %v4540_v46  ;;  %v5582_v46 = vand.u32 4294901760, %v4560_v40  ;;  %v5596_v11 = vld [vmem:[#allocation18_spill] sm:$0xff] }
  0x96   : > { %3685 = vmatprep.mubr.f32.mxu1 %v5571_v48  ;;  %3726 = vmatprep.subr.mxu0 %v5572_v30  ;;  %v5603_v48 = vld [vmem:[#allocation33_spill] sm:$0xff] }
  0x97   : > { %3727 = vmatpush3.msra.mxu0 %v5572_v30  ;;  %3804 = vmatprep.subr.mxu1 %v4136_v24  ;;  %v5604_v30 = vld [vmem:[#allocation37_spill] sm:$0xff] }
  0x98   : > { %3614 = vmatmul.mubr.f32.gmra.mxu0 %v5573_v13  ;;  %3805 = vmatpush3.msra.mxu1 %v4136_v24  ;;  %v5578_v24 = vand.u32 4294901760, %v5569_v7  ;;  %v5606_v13 = vld [vmem:[#allocation39_spill] sm:$0xff] }
  0x99   : > { %3686 = vmatmul.mubr.f32.gmra.mxu1 %v5574_v16  ;;  %3616 = vmatprep.mubr.f32.mxu0 %v4560_v40  ;;  %v5585_v40 = vand.u32 4294901760, %v4588_v63  ;;  %v5607_v16 = vld [vmem:[#allocation41_spill] sm:$0xff] }
  0x9a   : > { %3688 = vmatprep.mubr.f32.mxu1 %v5575_v61  ;;  %3728 = vmatprep.subr.mxu0 %v5576_v52  ;;  %v5608_v61 = vld [vmem:[#allocation42_spill] sm:$0xff] }
  0x9b   : > { %3729 = vmatpush3.msra.mxu0 %v5576_v52  ;;  %3806 = vmatprep.subr.mxu1 %v4145_v27  ;;  %v5609_v52 = vld [vmem:[#allocation43_spill] sm:$0xff] }
  0x9c   : > { %3617 = vmatmul.mubr.f32.gmra.mxu0 %v5577_v3  ;;  %3807 = vmatpush3.msra.mxu1 %v4145_v27  ;;  %v2420_v27 = vsel %vm2415_vm1, %v2410_v60, 0  ;;  %v5610_v3 = vld [vmem:[#allocation46_spill] sm:$0xff]  ;;  %v2408_v60 = vld [vmem:[%s5359_s2] sm:$0x3] }
  0x9d   : > { %3689 = vmatmul.mubr.f32.gmra.mxu1 %v5578_v24  ;;  %3619 = vmatprep.mubr.f32.mxu0 %v4588_v63  ;;  %v4875_v5 = vand.u32 4294901760, %v2420_v27  ;;  %v5588_v63 = vand.u32 4294901760, %v4621_v55  ;;  %v5611_v24 = vld [vmem:[#allocation47_spill] sm:$0xff] }
  0x9e   : > { %3691 = vmatprep.mubr.f32.mxu1 %v5579_v4  ;;  %3730 = vmatprep.subr.mxu0 %v5580_v6  ;;  %v2413_v4 = vsel %vm2411_vm2, %v2408_v60, 0 }
  0x9f   : > { %3731 = vmatpush3.msra.mxu0 %v5580_v6  ;;  %3808 = vmatprep.subr.mxu1 %v4169_v36  ;;  %v4889_v9 = vsub.f32 %v2420_v27, %v4875_v5 }
  0xa0   : > { %3620 = vmatmul.mubr.f32.gmra.mxu0 %v4601_v20  ;;  %3809 = vmatpush3.msra.mxu1 %v4169_v36  ;;  %v2409_v36 = vld [vmem:[%s212_s6] sm:$0x1f] }
  0xa1   : > { %3692 = vmatmul.mubr.f32.gmra.mxu1 %v5581_v23  ;;  %3622 = vmatprep.mubr.f32.mxu0 %v4621_v55  ;;  %v2417_v38 = vsel %vm2415_vm1, %v2409_v36, 0  ;;  %v2532_v29 = vand.u32 4294901760, %v4889_v9  ;;  %v5592_v55 = vand.u32 4294901760, %v4649_v12 }
  0xa2   : > { %3694 = vmatprep.mubr.f32.mxu1 %v5582_v46  ;;  %3732 = vmatprep.subr.mxu0 %v5583_v34  ;;  %v4899_v39 = vand.u32 4294901760, %v2417_v38 }
  0xa3   : > { %3733 = vmatpush3.msra.mxu0 %v5583_v34  ;;  %3810 = vmatprep.subr.mxu1 %v4185_v42  ;;  %v2533_v33 = vsub.f32 %v4889_v9, %v2532_v29 }
  0xa4   : > { %3623 = vmatmul.mubr.f32.gmra.mxu0 %v4636_v44  ;;  %3811 = vmatpush3.msra.mxu1 %v4185_v42  ;;  %v5587_v42 = vand.u32 4294901760, %v4601_v20  ;;  %v5591_v20 = vand.u32 4294901760, %v4636_v44  ;;  %v4913_v10 = vsub.f32 %v2417_v38, %v4899_v39  ;;  %v5594_v44 = vand.u32 4294901760, %v4663_v17 }
  0xa5   : > { %3695 = vmatmul.mubr.f32.gmra.mxu1 %v5584_v50  ;;  %3625 = vmatprep.mubr.f32.mxu0 %v4649_v12  ;;  %v5595_v12 = vld [vmem:[#allocation16_spill] sm:$0xff]  ;;  %v2534_v7 = vand.u32 4294901760, %v2533_v33 }
  0xa6   : > { %3697 = vmatprep.mubr.f32.mxu1 %v5585_v40  ;;  %3734 = vmatprep.subr.mxu0 %v5586_v59 }
  0xa7   : > { %3735 = vmatpush3.msra.mxu0 %v5586_v59  ;;  %3812 = vmatprep.subr.mxu1 %v4199_v49 }
  0xa8   : > { %3626 = vmatmul.mubr.f32.gmra.mxu0 %v4663_v17  ;;  %3813 = vmatpush3.msra.mxu1 %v4199_v49  ;;  %v5590_v49 = vld [vmem:[#allocation30_spill] sm:$0xff]  ;;  %v5597_v17 = vld [vmem:[#allocation24_spill] sm:$0xff] }
  0xa9   : > { %3698 = vmatmul.mubr.f32.gmra.mxu1 %v5587_v42  ;;  %3628 = vmatprep.mubr.f32.mxu0 %v4678_v37  ;;  %v5598_v37 = vand.u32 4294901760, %v4695_v31 }
  0xaa   : > { %3700 = vmatprep.mubr.f32.mxu1 %v5588_v63  ;;  %3736 = vmatprep.subr.mxu0 %v5589_v25 }
  0xab   : > { %3737 = vmatpush3.msra.mxu0 %v5589_v25  ;;  %3814 = vmatprep.subr.mxu1 %v5535_v45 }
  0xac   : > { %3629 = vmatmul.mubr.f32.gmra.mxu0 %v4688_v41  ;;  %3738 = vmatprep.subr.mxu0 %v5590_v49  ;;  %v5600_v41 = vand.u32 4294901760, %v4710_v2 }
  0xad   : > { %3701 = vmatmul.mubr.f32.gmra.mxu1 %v5591_v20  ;;  %3631 = vmatprep.mubr.f32.mxu0 %v4695_v31 }
  0xae   : > { %3703 = vmatprep.mubr.f32.mxu1 %v5592_v55  ;;  %3739 = vmatpush3.msra.mxu0 %v5590_v49 }
  0xaf   : > { %3815 = vmatpush3.msra.mxu1 %v5535_v45  ;;  %3740 = vmatprep.subr.mxu0 %v5593_v43  ;;  %v2538_v45 = vand.u32 4294901760, %v4913_v10 }
  0xb0   : > { %3632 = vmatmul.mubr.f32.gmra.mxu0 %v4710_v2  ;;  %3816 = vmatprep.subr.mxu1 %v4237_v1  ;;  %v5605_v2 = vld [vmem:[#allocation38_spill] sm:$0xff] }
  0xb1   : > { %3704 = vmatmul.mubr.f32.gmra.mxu1 %v5594_v44  ;;  %3741 = vmatpush3.msra.mxu0 %v5593_v43 }
  0xb2   : > { %3706 = vmatprep.mubr.f32.mxu1 %v727_v8  ;;  %3742 = vmatprep.mubr.f32.mxu0 %v5595_v12  ;;  %v5599_v8 = vld [vmem:[#allocation26_spill] sm:$0xff] }
  0xb3   : > { %3817 = vmatpush3.msra.mxu1 %v4237_v1  ;;  %2453 = vmatprep.subr.mxu0 %v4875_v5  ;;  %v2539_v1 = vsub.f32 %v4913_v10, %v2538_v45 }
  0xb4   : > { %3743 = vmatmul.mubr.f32.vlgmr.msra.gmra.mxu0 %v5596_v11  ;;  %3818 = vmatprep.subr.mxu1 %v5539_v56 }
  0xb5   : > { %3707 = vmatmul.mubr.f32.gmra.mxu1 %v737_v26  ;;  %3745 = vmatprep.mubr.f32.mxu0 %v5597_v17  ;;  %v5601_v26 = vld [vmem:[#allocation29_spill] sm:$0xff]  ;;  %v2540_v31 = vand.u32 4294901760, %v2539_v1 }
  0xb6   : > { %3709 = vmatprep.mubr.f32.mxu1 %v5598_v37  ;;  %3819 = vmatpush3.msra.mxu1 %v5539_v56  ;;  %v5602_v56 = vld [vmem:[#allocation31_spill] sm:$0xff] }
  0xb7   : > { %2455 = vmatpush1.msra.mxu0 %v4899_v39  ;;  %2535 = vmatprep.subr.mxu1 %v2534_v7 }
  0xb8   : > { %3746 = vmatmul.mubr.f32.gmra.mxu0 %v5599_v8  ;;  %2614 = vmatprep.subr.mxu0 %v4889_v9 }
  0xb9   : > { %3710 = vmatmul.mubr.f32.gmra.mxu1 %v5600_v41  ;;  %3748 = vmatprep.mubr.f32.mxu0 %v5601_v26 }
  0xba   : > { %3820 = vmatprep.mubr.f32.mxu1 %v5595_v12 }
  0xbc   : > { %3749 = vmatmul.mubr.f32.gmra.mxu0 %v5602_v56 }
  0xbd   : > { %3821 = vmatmul.mubr.f32.vlgmr.msra.gmra.mxu1 %v5596_v11  ;;  %3751 = vmatprep.mubr.f32.mxu0 %v5603_v48 }
  0xbe   : > { %3823 = vmatprep.mubr.f32.mxu1 %v5597_v17  ;;  %2541 = vmatpush1.msra.mxu1 %v2540_v31 }
  0xbf   : > { %2690 = vmatprep.subr.mxu1 %v4875_v5 }
  0xc0   : > { %3752 = vmatmul.mubr.f32.gmra.mxu0 %v5604_v30 }
  0xc1   : > { %3824 = vmatmul.mubr.f32.gmra.mxu1 %v5599_v8  ;;  %3754 = vmatprep.mubr.f32.mxu0 %v5605_v2 }
  0xc2   : > { %3826 = vmatprep.mubr.f32.mxu1 %v5601_v26 }
  0xc4   : > { %3755 = vmatmul.mubr.f32.gmra.mxu0 %v5606_v13 }
  0xc5   : > { %3827 = vmatmul.mubr.f32.gmra.mxu1 %v5602_v56  ;;  %3757 = vmatprep.mubr.f32.mxu0 %v5607_v16 }
  0xc6   : > { %3829 = vmatprep.mubr.f32.mxu1 %v5603_v48 }
  0xc8   : > { %3758 = vmatmul.mubr.f32.gmra.mxu0 %v5608_v61 }
  0xc9   : > { %3830 = vmatmul.mubr.f32.gmra.mxu1 %v5604_v30  ;;  %3760 = vmatprep.mubr.f32.mxu0 %v5609_v52 }
  0xca   : > { %3832 = vmatprep.mubr.f32.mxu1 %v5605_v2 }
  0xcc   : > { %3761 = vmatmul.mubr.f32.gmra.mxu0 %v5610_v3 }
  0xcd   : > { %3833 = vmatmul.mubr.f32.gmra.mxu1 %v5606_v13  ;;  %3763 = vmatprep.mubr.f32.mxu0 %v5611_v24 }
  0xce   : > { %3835 = vmatprep.mubr.f32.mxu1 %v5607_v16 }
  0xd0   : > { %3764 = vmatmul.mubr.f32.gmra.mxu0 %v4464_v58 }
  0xd1   : > { %3836 = vmatmul.mubr.f32.gmra.mxu1 %v5608_v61  ;;  %3766 = vmatprep.mubr.f32.mxu0 %v4483_v14 }
  0xd2   : > { %3838 = vmatprep.mubr.f32.mxu1 %v5609_v52 }
  0xd4   : > { %3767 = vmatmul.mubr.f32.gmra.mxu0 %v4498_v51 }
  0xd5   : > { %3839 = vmatmul.mubr.f32.gmra.mxu1 %v5610_v3  ;;  %3769 = vmatprep.mubr.f32.mxu0 %v4511_v21 }
  0xd6   : > { %3841 = vmatprep.mubr.f32.mxu1 %v5611_v24 }
  0xd8   : > { %3770 = vmatmul.mubr.f32.gmra.mxu0 %v4526_v22 }
  0xd9   : > { %3842 = vmatmul.mubr.f32.gmra.mxu1 %v4464_v58  ;;  %3772 = vmatprep.mubr.f32.mxu0 %v4530_v28  ;;  %v2489_v58 = vand.u32 4294901760, %v2413_v4 }
  0xda   : > { %3844 = vmatprep.mubr.f32.mxu1 %v4483_v14 }
  0xdb   : > { %v2490_v14 = vsub.f32 %v2413_v4, %v2489_v58 }
  0xdc   : > { %3773 = vmatmul.mubr.f32.gmra.mxu0 %v4553_v62 }
  0xdd   : > { %3845 = vmatmul.mubr.f32.gmra.mxu1 %v4498_v51  ;;  %3775 = vmatprep.mubr.f32.mxu0 %v4562_v47  ;;  %v2491_v51 = vand.u32 4294901760, %v2490_v14 }
  0xde   : > { %3847 = vmatprep.mubr.f32.mxu1 %v4511_v21 }
  0xe0   : > { %3776 = vmatmul.mubr.f32.gmra.mxu0 %v4572_v19 }
  0xe1   : > { %3848 = vmatmul.mubr.f32.gmra.mxu1 %v4526_v22  ;;  %3778 = vmatprep.mubr.f32.mxu0 %v4595_v57  ;;  %v3991_v22 = vmov 0.0  }
  0xe2   : > { %3850 = vmatprep.mubr.f32.mxu1 %v4530_v28  ;;  %v2492_v28 = vsub.f32 %v2490_v14, %v2491_v51 }
  0xe4   : > { %3779 = vmatmul.mubr.f32.gmra.mxu0 %v4609_v18  ;;  %v2493_v21 = vand.u32 4294901760, %v2492_v28 }
  0xe5   : > { %3851 = vmatmul.mubr.f32.gmra.mxu1 %v4553_v62  ;;  %3781 = vmatprep.mubr.f32.mxu0 %v4623_v35 }
  0xe6   : > { %3853 = vmatprep.mubr.f32.mxu1 %v4562_v47 }
  0xe8   : > { %3782 = vmatmul.mubr.f32.gmra.mxu0 %v4638_v32 }
  0xe9   : > { %3854 = vmatmul.mubr.f32.gmra.mxu1 %v4572_v19  ;;  %3784 = vmatprep.mubr.f32.mxu0 %v4651_v54 }
  0xea   : > { %3856 = vmatprep.mubr.f32.mxu1 %v4595_v57 }
  0xec   : > { %3785 = vmatmul.mubr.f32.gmra.mxu0 %v4665_v53 }
  0xed   : > { %3857 = vmatmul.mubr.f32.gmra.mxu1 %v4609_v18  ;;  %3787 = vmatprep.mubr.f32.mxu0 %v4669_v0 }
  0xee   : > { %3859 = vmatprep.mubr.f32.mxu1 %v4623_v35 }
  0xf0   : > { %3788 = vmatmul.mubr.f32.gmra.mxu0 %v4690_v15 }
  0xf1   : > { %3860 = vmatmul.mubr.f32.gmra.mxu1 %v4638_v32  ;;  %2488 = vmatprep.mubr.f32.mxu0 %v3991_v22 }
  0xf2   : > { %3862 = vmatprep.mubr.f32.mxu1 %v4651_v54 }
  0xf4   : > { %v3432_v62 = vpop.f32.mrf.mxu0  ;;  %2494 = vmatmul.mubr.f32.vlgmr.msra.gmra.mxu0 %v2493_v21 }
  0xf5   : > { %3863 = vmatmul.mubr.f32.gmra.mxu1 %v4665_v53  ;;  %2617 = vmatpush1.msra.mxu0 %v4913_v10 }
  0xf6   : > { %v451_v57 = vpop.f32.mrf.mxu0  ;;  %3865 = vmatprep.mubr.f32.mxu1 %v4669_v0  ;;  %2650 = vmatprep.mubr.f32.mxu0 %v3991_v22 }
  0xf7   : > { %2768 = vmatprep.subr.mxu0 %v2532_v29 }
  0xf8   : > { %v3435_v35 = vpop.f32.mrf.mxu0  ;;  %2653 = vmatmul.mubr.f32.vlgmr.msra.gmra.mxu0 %v2490_v14 }
  0xf9   : > { %3866 = vmatmul.mubr.f32.gmra.mxu1 %v4690_v15  ;;  %2772 = vmatpush1.msra.mxu0 %v2538_v45 }
  0xfa   : > { %v471_v54 = vpop.f32.mrf.mxu0  ;;  %2574 = vmatprep.mubr.f32.mxu1 %v3991_v22  ;;  %2805 = vmatprep.mubr.f32.mxu0 %v3991_v22 }
  0xfc   : > { %v3438_v32 = vpop.f32.mrf.mxu0  ;;  %2807 = vmatmul.mubr.f32.vlgmr.msra.gmra.mxu0 %v2489_v58 }
  0xfd   : > { %v3510_v47 = vpop.f32.mrf.mxu1  ;;  %2576 = vmatmul.mubr.f32.vlgmr.msra.gmra.mxu1 %v2489_v58 }
  0xfe   : > { %v5016_v19 = vadd.f32 %v3510_v47, %v3432_v62  ;;  %v491_v18 = vpop.f32.mrf.mxu0  ;;  %2692 = vmatpush1.msra.mxu1 %v4899_v39  ;;  %2725 = vmatprep.mubr.f32.mxu1 %v3991_v22 }
  0xff   : > { %v907_v53 = vpop.f32.mrf.mxu1  ;;  %2844 = vmatprep.subr.mxu1 %v4875_v5 }
 0x100   : > { %v5020_v0 = vadd.f32 %v907_v53, %v451_v57  ;;  %v3441_v15 = vpop.f32.mrf.mxu0 }
 0x101   : > { %v3513_v6 = vpop.f32.mrf.mxu1  ;;  %2729 = vmatmul.mubr.f32.vlgmr.msra.gmra.mxu1 %v2491_v51 }
 0x102   : > { %v5022_v27 = vadd.f32 %v3513_v6, %v3435_v35  ;;  %v511_v23 = vpop.f32.mrf.mxu0  ;;  %2846 = vmatpush1.msra.mxu1 %v4899_v39  ;;  %2879 = vmatprep.mubr.f32.mxu1 %v3991_v22 }
 0x103   : > { %v919_v46 = vpop.f32.mrf.mxu1 }
 0x104   : > { %v5025_v34 = vadd.f32 %v919_v46, %v471_v54  ;;  %v3444_v36 = vpop.f32.mrf.mxu0 }
 0x105   : > { %v3516_v50 = vpop.f32.mrf.mxu1  ;;  %2881 = vmatmul.mubr.f32.vlgmr.msra.gmra.mxu1 %v2489_v58 }
 0x106   : > { %v5027_v40 = vadd.f32 %v3516_v50, %v3438_v32  ;;  %v531_v5 = vpop.f32.mrf.mxu0 }
 0x107   : > { %v931_v59 = vpop.f32.mrf.mxu1 }
 0x108   : > { %v5029_v38 = vadd.f32 %v931_v59, %v491_v18  ;;  %v3447_v9 = vpop.f32.mrf.mxu0 }
 0x109   : > { %v3519_v42 = vpop.f32.mrf.mxu1 }
 0x10a   : > { %v5031_v63 = vadd.f32 %v3519_v42, %v3441_v15  ;;  %v551_v25 = vpop.f32.mrf.mxu0 }
 0x10b   : > { %v943_v29 = vpop.f32.mrf.mxu1 }
 0x10c   : > { %v5033_v39 = vadd.f32 %v943_v29, %v511_v23  ;;  %v3450_v49 = vpop.f32.mrf.mxu0 }
 0x10d   : > { %v3522_v20 = vpop.f32.mrf.mxu1 }
 0x10e   : > { %v5035_v55 = vadd.f32 %v3522_v20, %v3444_v36  ;;  %v571_v10 = vpop.f32.mrf.mxu0 }
 0x10f   : > { %v955_v43 = vpop.f32.mrf.mxu1 }
 0x110   : > { %v5037_v33 = vadd.f32 %v955_v43, %v531_v5  ;;  %v3453_v44 = vpop.f32.mrf.mxu0 }
 0x111   : > { %v3525_v12 = vpop.f32.mrf.mxu1 }
 0x112   : > { %v5039_v45 = vadd.f32 %v3525_v12, %v3447_v9  ;;  %v591_v7 = vpop.f32.mrf.mxu0 }
 0x113   : > { %v967_v11 = vpop.f32.mrf.mxu1 }
 0x114   : > { %v5041_v17 = vadd.f32 %v967_v11, %v551_v25  ;;  %v3456_v37 = vpop.f32.mrf.mxu0 }
 0x115   : > { %v3528_v1 = vpop.f32.mrf.mxu1 }
 0x116   : > { %v5043_v8 = vadd.f32 %v3528_v1, %v3450_v49  ;;  %v611_v41 = vpop.f32.mrf.mxu0 }
 0x117   : > { %v979_v26 = vpop.f32.mrf.mxu1 }
 0x118   : > { %v5045_v31 = vadd.f32 %v979_v26, %v571_v10  ;;  %v3459_v56 = vpop.f32.mrf.mxu0 }
 0x119   : > { %v3531_v48 = vpop.f32.mrf.mxu1 }
 0x11a   : > { %v5047_v30 = vadd.f32 %v3531_v48, %v3453_v44  ;;  %v631_v2 = vpop.f32.mrf.mxu0 }
 0x11b   : > { %v991_v13 = vpop.f32.mrf.mxu1 }
 0x11c   : > { %v5049_v16 = vadd.f32 %v991_v13, %v591_v7  ;;  %v3462_v61 = vpop.f32.mrf.mxu0 }
 0x11d   : > { %v3534_v52 = vpop.f32.mrf.mxu1 }
 0x11e   : > { %v5051_v3 = vadd.f32 %v3534_v52, %v3456_v37  ;;  %v651_v24 = vpop.f32.mrf.mxu0 }
 0x11f   : > { %v1003_v60 = vpop.f32.mrf.mxu1 }
 0x120   : > { %v5053_v4 = vadd.f32 %v1003_v60, %v611_v41  ;;  %v3465_v58 = vpop.f32.mrf.mxu0 }
 0x121   : > { %v3537_v14 = vpop.f32.mrf.mxu1 }
 0x122   : > { %v5055_v51 = vadd.f32 %v3537_v14, %v3459_v56  ;;  %v671_v28 = vpop.f32.mrf.mxu0 }
 0x123   : > { %v1015_v21 = vpop.f32.mrf.mxu1 }
 0x124   : > { %v5057_v22 = vadd.f32 %v1015_v21, %v631_v2  ;;  %v3468_v62 = vpop.f32.mrf.mxu0 }
 0x125   : > { %v3540_v57 = vpop.f32.mrf.mxu1 }
 0x126   : > { %v5059_v35 = vadd.f32 %v3540_v57, %v3462_v61  ;;  %v691_v54 = vpop.f32.mrf.mxu0 }
 0x127   : > { %v1027_v32 = vpop.f32.mrf.mxu1 }
 0x128   : > { %v5061_v47 = vadd.f32 %v1027_v32, %v651_v24  ;;  %v3471_v18 = vpop.f32.mrf.mxu0 }
 0x129   : > { %v3543_v53 = vpop.f32.mrf.mxu1 }
 0x12a   : > { %v5063_v15 = vadd.f32 %v3543_v53, %v3465_v58  ;;  %v711_v6 = vpop.f32.mrf.mxu0 }
 0x12b   : > { %v1039_v23 = vpop.f32.mrf.mxu1 }
 0x12c   : > { %v5065_v46 = vadd.f32 %v1039_v23, %v671_v28  ;;  %v3474_v36 = vpop.f32.mrf.mxu0 }
 0x12d   : > { %v3546_v50 = vpop.f32.mrf.mxu1 }
 0x12e   : > { %v5067_v5 = vadd.f32 %v3546_v50, %v3468_v62  ;;  %v731_v59 = vpop.f32.mrf.mxu0 }
 0x12f   : > { %v1051_v9 = vpop.f32.mrf.mxu1 }
 0x130   : > { %v5069_v42 = vadd.f32 %v1051_v9, %v691_v54  ;;  %v3477_v25 = vpop.f32.mrf.mxu0 }
 0x131   : > { %v3549_v29 = vpop.f32.mrf.mxu1 }
 0x132   : > { %v5071_v49 = vadd.f32 %v3549_v29, %v3471_v18  ;;  %v751_v20 = vpop.f32.mrf.mxu0 }
 0x133   : > { %v1063_v10 = vpop.f32.mrf.mxu1 }
 0x134   : > { %v5073_v43 = vadd.f32 %v1063_v10, %v711_v6  ;;  %v3588_v44 = vpop.f32.mrf.mxu0 }
 0x135   : > { %v3552_v12 = vpop.f32.mrf.mxu1  ;;  %v1203_v7 = vadd.f32 %v3588_v44, %v5016_v19 }
 0x136   : > { %v5076_v11 = vadd.f32 %v3552_v12, %v3474_v36  ;;  %v5078_v37 = vpop.f32.mrf.mxu0 }
 0x137   : > { %v1075_v1 = vpop.f32.mrf.mxu1 }
 0x138   : > { %v5080_v41 = vadd.f32 %v1075_v1, %v731_v59  ;;  %v3591_v26 = vpop.f32.mrf.mxu0 }
 0x139   : > { %v3555_v56 = vpop.f32.mrf.mxu1  ;;  %v1217_v48 = vadd.f32 %v3591_v26, %v5022_v27 }
 0x13a   : > { %v5083_v2 = vadd.f32 %v3555_v56, %v3477_v25  ;;  %v1209_v13 = vpop.f32.mrf.mxu0 }
 0x13b   : > { %v1087_v61 = vpop.f32.mrf.mxu1  ;;  %v1210_v52 = vadd.f32 %v1209_v13, %v5025_v34 }
 0x13c   : > { %v5086_v24 = vadd.f32 %v1087_v61, %v751_v20  ;;  %v3594_v19 = vpop.f32.mrf.mxu0 }
 0x13d   : > { %v1231_v60 = vadd.f32 %v3594_v19, %v5027_v40  ;;  %v3666_v58 = vpop.f32.mrf.mxu1 }
 0x13e   : > { %v5089_v14 = vadd.f32 %v3666_v58, %v1203_v7  ;;  %v1223_v28 = vpop.f32.mrf.mxu0 }
 0x13f   : > { %v1224_v21 = vadd.f32 %v1223_v28, %v5029_v38  ;;  %v5092_v62 = vpop.f32.mrf.mxu1 }
 0x140   : > { %v3597_v27 = vpop.f32.mrf.mxu0 }
 0x141   : > { %v1245_v57 = vadd.f32 %v3597_v27, %v5031_v63  ;;  %v3669_v54 = vpop.f32.mrf.mxu1 }
 0x142   : > { %v5095_v32 = vadd.f32 %v3669_v54, %v1217_v48  ;;  %v1237_v34 = vpop.f32.mrf.mxu0 }
 0x143   : > { %v1238_v18 = vadd.f32 %v1237_v34, %v5033_v39  ;;  %v1516_v53 = vpop.f32.mrf.mxu1 }
 0x144   : > { %v5098_v6 = vadd.f32 %v1516_v53, %v1210_v52  ;;  %v3600_v40 = vpop.f32.mrf.mxu0 }
 0x145   : > { %v1259_v23 = vadd.f32 %v3600_v40, %v5035_v55  ;;  %v3672_v36 = vpop.f32.mrf.mxu1 }
 0x146   : > { %v5101_v50 = vadd.f32 %v3672_v36, %v1231_v60  ;;  %v1251_v38 = vpop.f32.mrf.mxu0 }
 0x147   : > { %v1252_v59 = vadd.f32 %v1251_v38, %v5037_v33  ;;  %v1532_v9 = vpop.f32.mrf.mxu1 }
 0x148   : > { %v5104_v63 = vadd.f32 %v1532_v9, %v1224_v21  ;;  %v3603_v25 = vpop.f32.mrf.mxu0 }
 0x149   : > { %v1273_v29 = vadd.f32 %v3603_v25, %v5039_v45  ;;  %v3675_v20 = vpop.f32.mrf.mxu1 }
 0x14a   : > { %v5107_v39 = vadd.f32 %v3675_v20, %v1245_v57  ;;  %v1265_v10 = vpop.f32.mrf.mxu0 }
 0x14b   : > { %v1266_v44 = vadd.f32 %v1265_v10, %v5041_v17  ;;  %v1548_v12 = vpop.f32.mrf.mxu1 }
 0x14c   : > { %v5110_v55 = vadd.f32 %v1548_v12, %v1238_v18  ;;  %v3606_v7 = vpop.f32.mrf.mxu0 }
 0x14d   : > { %v1287_v1 = vadd.f32 %v3606_v7, %v5043_v8  ;;  %v3678_v26 = vpop.f32.mrf.mxu1 }
 0x14e   : > { %v5113_v33 = vadd.f32 %v3678_v26, %v1259_v23  ;;  %v1279_v56 = vpop.f32.mrf.mxu0 }
 0x14f   : > { %v1280_v48 = vadd.f32 %v1279_v56, %v5045_v31  ;;  %v1564_v13 = vpop.f32.mrf.mxu1 }
 0x150   : > { %v5116_v45 = vadd.f32 %v1564_v13, %v1252_v59  ;;  %v3609_v61 = vpop.f32.mrf.mxu0 }
 0x151   : > { %v1301_v52 = vadd.f32 %v3609_v61, %v5047_v30  ;;  %v3681_v19 = vpop.f32.mrf.mxu1 }
 0x152   : > { %v5119_v17 = vadd.f32 %v3681_v19, %v1273_v29  ;;  %v1293_v60 = vpop.f32.mrf.mxu0 }
 0x153   : > { %v1294_v58 = vadd.f32 %v1293_v60, %v5049_v16  ;;  %v1580_v28 = vpop.f32.mrf.mxu1 }
 0x154   : > { %v5122_v8 = vadd.f32 %v1580_v28, %v1266_v44  ;;  %v3612_v21 = vpop.f32.mrf.mxu0 }
 0x155   : > { %v1315_v27 = vadd.f32 %v3612_v21, %v5051_v3  ;;  %v3684_v57 = vpop.f32.mrf.mxu1 }
 0x156   : > { %v5125_v31 = vadd.f32 %v3684_v57, %v1287_v1  ;;  %v5127_v54 = vpop.f32.mrf.mxu0 }
 0x157   : > { %v1596_v34 = vpop.f32.mrf.mxu1 }
 0x158   : > { %v5129_v18 = vadd.f32 %v1596_v34, %v1280_v48  ;;  %v3615_v30 = vpop.f32.mrf.mxu0 }
 0x159   : > { %v1329_v53 = vadd.f32 %v3615_v30, %v5055_v51  ;;  %v3687_v40 = vpop.f32.mrf.mxu1 }
 0x15a   : > { %v5132_v23 = vadd.f32 %v3687_v40, %v1301_v52  ;;  %v1321_v16 = vpop.f32.mrf.mxu0 }
 0x15b   : > { %v1322_v36 = vadd.f32 %v1321_v16, %v5057_v22  ;;  %v1612_v38 = vpop.f32.mrf.mxu1 }
 0x15c   : > { %v5135_v59 = vadd.f32 %v1612_v38, %v1294_v58  ;;  %v3618_v3 = vpop.f32.mrf.mxu0 }
 0x15d   : > { %v1343_v9 = vadd.f32 %v3618_v3, %v5059_v35  ;;  %v3690_v25 = vpop.f32.mrf.mxu1 }
 0x15e   : > { %v5138_v29 = vadd.f32 %v3690_v25, %v1315_v27  ;;  %v1335_v20 = vpop.f32.mrf.mxu0 }
 0x15f   : > { %v1336_v10 = vadd.f32 %v1335_v20, %v5061_v47  ;;  %v5141_v44 = vpop.f32.mrf.mxu1 }
 0x160   : > { %v3621_v51 = vpop.f32.mrf.mxu0 }
 0x161   : > { %v1357_v12 = vadd.f32 %v3621_v51, %v5063_v15  ;;  %v3693_v7 = vpop.f32.mrf.mxu1 }
 0x162   : > { %v5144_v1 = vadd.f32 %v3693_v7, %v1329_v53  ;;  %v1349_v22 = vpop.f32.mrf.mxu0 }
 0x163   : > { %v1350_v26 = vadd.f32 %v1349_v22, %v5065_v46  ;;  %v1644_v56 = vpop.f32.mrf.mxu1 }
 0x164   : > { %v5147_v48 = vadd.f32 %v1644_v56, %v1322_v36  ;;  %v3624_v35 = vpop.f32.mrf.mxu0 }
 0x165   : > { %v1371_v13 = vadd.f32 %v3624_v35, %v5067_v5  ;;  %v3696_v61 = vpop.f32.mrf.mxu1 }
 0x166   : > { %v5150_v52 = vadd.f32 %v3696_v61, %v1343_v9  ;;  %v1363_v47 = vpop.f32.mrf.mxu0 }
 0x167   : > { %v1364_v19 = vadd.f32 %v1363_v47, %v5069_v42  ;;  %v1660_v60 = vpop.f32.mrf.mxu1 }
 0x168   : > { %v5153_v15 = vadd.f32 %v1660_v60, %v1336_v10  ;;  %v3627_v58 = vpop.f32.mrf.mxu0 }
 0x169   : > { %v1385_v28 = vadd.f32 %v3627_v58, %v5071_v49  ;;  %v3699_v21 = vpop.f32.mrf.mxu1 }
 0x16a   : > { %v5156_v46 = vadd.f32 %v3699_v21, %v1357_v12  ;;  %v1377_v27 = vpop.f32.mrf.mxu0 }
 0x16b   : > { %v1378_v57 = vadd.f32 %v1377_v27, %v5073_v43  ;;  %v1676_v34 = vpop.f32.mrf.mxu1 }
 0x16c   : > { %v5159_v5 = vadd.f32 %v1676_v34, %v1350_v26  ;;  %v3630_v30 = vpop.f32.mrf.mxu0 }
 0x16d   : > { %v1399_v53 = vadd.f32 %v3630_v30, %v5076_v11  ;;  %v3702_v40 = vpop.f32.mrf.mxu1 }
 0x16e   : > { %v5162_v42 = vadd.f32 %v3702_v40, %v1371_v13  ;;  %v1391_v16 = vpop.f32.mrf.mxu0 }
 0x16f   : > { %v1392_v36 = vadd.f32 %v1391_v16, %v5080_v41  ;;  %v1692_v38 = vpop.f32.mrf.mxu1 }
 0x170   : > { %v5165_v49 = vadd.f32 %v1692_v38, %v1364_v19  ;;  %v3633_v3 = vpop.f32.mrf.mxu0 }
 0x171   : > { %v1413_v9 = vadd.f32 %v3633_v3, %v5083_v2  ;;  %v3705_v25 = vpop.f32.mrf.mxu1  ;;  %v1196_v2 = vadd.f32 %v5078_v37, %v5020_v0 }
 0x172   : > { %v5168_v43 = vadd.f32 %v3705_v25, %v1385_v28  ;;  %v1405_v20 = vpop.f32.mrf.mxu0 }
 0x173   : > { %v1406_v10 = vadd.f32 %v1405_v20, %v5086_v24  ;;  %v1708_v51 = vpop.f32.mrf.mxu1  ;;  %v1501_v19 = vadd.f32 %v5092_v62, %v1196_v2 }
 0x174   : > { %v5171_v11 = vadd.f32 %v1708_v51, %v1378_v57  ;;  %v3744_v12 = vpop.f32.mrf.mxu0 }
 0x175   : > { %v3708_v7 = vpop.f32.mrf.mxu1  ;;  %v1871_v40 = vadd.f32 %v3744_v12, %v5089_v14 }
 0x176   : > { %v5173_v22 = vadd.f32 %v3708_v7, %v1399_v53  ;;  %v1864_v41 = vpop.f32.mrf.mxu0 }
 0x177   : > { %v1724_v26 = vpop.f32.mrf.mxu1  ;;  %v1865_v21 = vadd.f32 %v1864_v41, %v1501_v19 }
 0x178   : > { %v5175_v56 = vadd.f32 %v1724_v26, %v1392_v36  ;;  %v3747_v35 = vpop.f32.mrf.mxu0 }
 0x179   : > { %v3711_v13 = vpop.f32.mrf.mxu1  ;;  %v1883_v51 = vadd.f32 %v3747_v35, %v5095_v32 }
 0x17a   : > { %v5179_v61 = vadd.f32 %v3711_v13, %v1413_v9  ;;  %v1876_v47 = vpop.f32.mrf.mxu0 }
 0x17b   : > { %v1740_v24 = vpop.f32.mrf.mxu1  ;;  %v1877_v62 = vadd.f32 %v1876_v47, %v5098_v6 }
 0x17c   : > { %v5182_v60 = vadd.f32 %v1740_v24, %v1406_v10  ;;  %v3750_v58 = vpop.f32.mrf.mxu0 }
 0x17d   : > { %v3822_v28 = vpop.f32.mrf.mxu1 }
 0x17e   : > { %v1888_v27 = vpop.f32.mrf.mxu0  ;;  %v2143_v16 = vadd.f32 %v3822_v28, %v1871_v40  ;;  %v1895_v28 = vadd.f32 %v3750_v58, %v5101_v50  ;;  %v1308_v50 = vadd.f32 %v5127_v54, %v5053_v4 }
 0x17f   : > { %v2136_v57 = vpop.f32.mrf.mxu1  ;;  %v1889_v13 = vadd.f32 %v1888_v27, %v5104_v63 }
 0x180   : > { %v3753_v34 = vpop.f32.mrf.mxu0  ;;  %v2137_v30 = vadd.f32 %v2136_v57, %v1865_v21 }
 0x181   : > { %v3825_v53 = vpop.f32.mrf.mxu1  ;;  %v1907_v58 = vadd.f32 %v3753_v34, %v5107_v39 }
 0x182   : > { %2326 = vxpose.xlu0.b32.start [1/16] (narrow) %v2137_v30, 8  ;;  %v1900_v0 = vpop.f32.mrf.mxu0  ;;  %v2155_v12 = vadd.f32 %v3825_v53, %v1883_v51 }
 0x183   : > { %v2148_v37 = vpop.f32.mrf.mxu1  ;;  %v1901_v63 = vadd.f32 %v1900_v0, %v5110_v55 }
 0x184   : > { %v3756_v36 = vpop.f32.mrf.mxu0  ;;  %v2149_v25 = vadd.f32 %v2148_v37, %v1877_v62 }
 0x185   : > { %v3828_v38 = vpop.f32.mrf.mxu1  ;;  %v1919_v54 = vadd.f32 %v3756_v36, %v5113_v33 }
 0x186   : > { %2327 = vxpose.xlu0.b32.cont [2/16] (narrow) %v2143_v16, 8  ;;  %v1912_v3 = vpop.f32.mrf.mxu0  ;;  %v2167_v21 = vadd.f32 %v3828_v38, %v1895_v28 }
 0x187   : > { %v2160_v9 = vpop.f32.mrf.mxu1  ;;  %v1913_v51 = vadd.f32 %v1912_v3, %v5116_v45 }
 0x188   : > { %v5186_v20 = vpop.f32.mrf.mxu0  ;;  %v2161_v47 = vadd.f32 %v2160_v9, %v1889_v13  ;;  %v1629_v9 = vadd.f32 %v5141_v44, %v1308_v50 }
 0x189   : > { %v3831_v10 = vpop.f32.mrf.mxu1 }
 0x18a   : > { %2328 = vxpose.xlu0.b32.cont [3/16] (narrow) %v2149_v25, 8  ;;  %v1924_v7 = vpop.f32.mrf.mxu0  ;;  %v2179_v25 = vadd.f32 %v3831_v10, %v1907_v58 }
 0x18b   : > { %v2172_v14 = vpop.f32.mrf.mxu1 }
 0x18c   : > { %v5189_v41 = vpop.f32.mrf.mxu0  ;;  %v2173_v40 = vadd.f32 %v2172_v14, %v1901_v63 }
 0x18d   : > { %v3834_v26 = vpop.f32.mrf.mxu1 }
 0x18e   : > { %2329 = vxpose.xlu0.b32.cont [4/16] (narrow) %v2155_v12, 8  ;;  %v5192_v6 = vpop.f32.mrf.mxu0 }
 0x18f   : > { %v2184_v2 = vpop.f32.mrf.mxu1 }
 0x190   : > { %v5194_v24 = vpop.f32.mrf.mxu0 }
 0x191   : > { %v3837_v19 = vpop.f32.mrf.mxu1 }
 0x192   : > { %2330 = vxpose.xlu0.b32.cont [5/16] (narrow) %v2161_v47, 8  ;;  %v5197_v32 = vpop.f32.mrf.mxu0  ;;  %v2185_v47 = vadd.f32 %v2184_v2, %v1913_v51 }
 0x193   : > { %v2196_v35 = vpop.f32.mrf.mxu1 }
 0x194   : > { %v3768_v57 = vpop.f32.mrf.mxu0 }
 0x195   : > { %v5199_v30 = vpop.f32.mrf.mxu1  ;;  %v1967_v34 = vadd.f32 %v3768_v57, %v5138_v29 }
 0x196   : > { %2331 = vxpose.xlu0.b32.cont [6/16] (narrow) %v2167_v21, 8  ;;  %v1960_v27 = vpop.f32.mrf.mxu0  ;;  %v2191_v21 = vadd.f32 %v3834_v26, %v1919_v54  ;;  %v1931_v26 = vadd.f32 %v5186_v20, %v5119_v17 }
 0x197   : > { %v2208_v53 = vpop.f32.mrf.mxu1  ;;  %v1961_v14 = vadd.f32 %v1960_v27, %v1629_v9  ;;  %v1925_v27 = vadd.f32 %v1924_v7, %v5122_v8 }
 0x198   : > { %v3771_v37 = vpop.f32.mrf.mxu0 }
 0x199   : > { %v5202_v16 = vpop.f32.mrf.mxu1  ;;  %v2197_v33 = vadd.f32 %v2196_v35, %v1925_v27  ;;  %v1979_v58 = vadd.f32 %v3771_v37, %v5144_v1  ;;  %v1937_v35 = vadd.f32 %v5192_v6, %v5129_v18 }
 0x19a   : > { %2332 = vxpose.xlu0.b32.cont [7/16] (narrow) %v2173_v40, 8  ;;  %v1972_v62 = vpop.f32.mrf.mxu0 }
 0x19b   : > { %v5207_v38 = vpop.f32.mrf.mxu1  ;;  %v1973_v2 = vadd.f32 %v1972_v62, %v5147_v48  ;;  %v2203_v48 = vadd.f32 %v3837_v19, %v1931_v26  ;;  %v2209_v20 = vadd.f32 %v2208_v53, %v1937_v35  ;;  %v1943_v19 = vadd.f32 %v5189_v41, %v5125_v31 }
 0x19c   : > { %v3774_v55 = vpop.f32.mrf.mxu0 }
 0x19d   : > { %v3846_v0 = vpop.f32.mrf.mxu1  ;;  %v2215_v6 = vadd.f32 %v5199_v30, %v1943_v19  ;;  %v1955_v30 = vadd.f32 %v5194_v24, %v5132_v23 }
 0x19e   : > { %2333 = vxpose.xlu0.b32.cont [8/16] (narrow) %v2179_v25, 8  ;;  %v1984_v12 = vpop.f32.mrf.mxu0  ;;  %v2239_v63 = vadd.f32 %v3846_v0, %v1967_v34 }
 0x19f   : > { %v2232_v13 = vpop.f32.mrf.mxu1  ;;  %v1985_v0 = vadd.f32 %v1984_v12, %v5153_v15 }
 0x1a0   : > { %v5211_v28 = vpop.f32.mrf.mxu0  ;;  %v2233_v4 = vadd.f32 %v2232_v13, %v1961_v14  ;;  %v1991_v13 = vadd.f32 %v3774_v55, %v5150_v52 }
 0x1a1   : > { %v3849_v39 = vpop.f32.mrf.mxu1 }
 0x1a2   : > { %2358 = vxpose.xlu1.b32.start [1/16] (narrow) %v2233_v4, 8  ;;  %2334 = vxpose.xlu0.b32.cont [9/16] (narrow) %v2185_v47, 8  ;;  %v1996_v44 = vpop.f32.mrf.mxu0  ;;  %v2251_v7 = vadd.f32 %v3849_v39, %v1979_v58  ;;  %v1949_v4 = vadd.f32 %v5197_v32, %v5135_v59  ;;  %v2227_v32 = vadd.f32 %v5202_v16, %v1955_v30 }
 0x1a3   : > { %v2244_v10 = vpop.f32.mrf.mxu1  ;;  %v1997_v39 = vadd.f32 %v1996_v44, %v5159_v5 }
 0x1a4   : > { %v5215_v45 = vpop.f32.mrf.mxu0  ;;  %v2245_v36 = vadd.f32 %v2244_v10, %v1973_v2  ;;  %v2221_v41 = vadd.f32 %v5207_v38, %v1949_v4  ;;  %v2003_v10 = vadd.f32 %v5211_v28, %v5156_v46  ;;  %v3992_v28 = vmov 1966171168  }
 0x1a5   : > { %v3852_v3 = vpop.f32.mrf.mxu1 }
 0x1a6   : > { %2359 = vxpose.xlu1.b32.cont [2/16] (narrow) %v2239_v63, 8  ;;  %2335 = vxpose.xlu0.b32.cont [10/16] (narrow) %v2191_v21, 8  ;;  %v2008_v40 = vpop.f32.mrf.mxu0  ;;  %v2263_v12 = vadd.f32 %v3852_v3, %v1991_v13 }
 0x1a7   : > { %v2256_v50 = vpop.f32.mrf.mxu1  ;;  %v2009_v38 = vadd.f32 %v2008_v40, %v5165_v49 }
 0x1a8   : > { %v5219_v29 = vpop.f32.mrf.mxu0  ;;  %v2257_v37 = vadd.f32 %v2256_v50, %v1985_v0  ;;  %v2937_v50 = vunpack.c.l.s4 %v3992_v28 }
 0x1a9   : > { %v3855_v57 = vpop.f32.mrf.mxu1 }
 0x1aa   : > { %2360 = vxpose.xlu1.b32.cont [3/16] (narrow) %v2245_v36, 8  ;;  %2336 = vxpose.xlu0.b32.cont [11/16] (narrow) %v2197_v33, 8  ;;  %v5224_v9 = vpop.f32.mrf.mxu0  ;;  %v2275_v44 = vadd.f32 %v3855_v57, %v2003_v10  ;;  %v2939_v33 = vlaneseq  ;;  %v2015_v36 = vadd.f32 %v5215_v45, %v5162_v42 }
 0x1ab   : > { %v2268_v8 = vpop.f32.mrf.mxu1  ;;  %v2021_v0 = vadd.f32 %v5224_v9, %v5171_v11 }
 0x1ac   : > { %v5226_v62 = vpop.f32.mrf.mxu0  ;;  %v2269_v55 = vadd.f32 %v2268_v8, %v1997_v39  ;;  %v2940_v35 = vshrl.u32 %v2939_v33, 7  ;;  %vm5282_vm3 = vcmp.lt.s32.totalorder %v2939_v33, 256 }
 0x1ad   : > { %v3858_v25 = vpop.f32.mrf.mxu1 }
 0x1ae   : > { %2361 = vxpose.xlu1.b32.cont [4/16] (narrow) %v2251_v7, 8  ;;  %2337 = vxpose.xlu0.b32.cont [12/16] (narrow) %v2203_v48, 8  ;;  %v5231_v17 = vpop.f32.mrf.mxu0  ;;  %v2287_v40 = vadd.f32 %v3858_v25, %v2015_v36  ;;  %v2938_v7 = vunpack.c.0.s8 %v2937_v50 }
 0x1af   : > { %v2280_v1 = vpop.f32.mrf.mxu1 }
 0x1b0   : > { %v5233_v51 = vpop.f32.mrf.mxu0  ;;  %v2281_v23 = vadd.f32 %v2280_v1, %v2009_v38  ;;  %v5267_v25 = vsub.s32 %v2938_v7, %v2940_v35 }
 0x1b1   : > { %v5235_v14 = vpop.f32.mrf.mxu1  ;;  %v2051_v30 = vadd.f32 %v5233_v51, %v5179_v61 }
 0x1b2   : > { %2362 = vxpose.xlu1.b32.cont [5/16] (narrow) %v2257_v37, 8  ;;  %2338 = vxpose.xlu0.b32.cont [13/16] (narrow) %v2209_v20, 8  ;;  %v5240_v18 = vpop.f32.mrf.mxu0 }
 0x1b3   : > { %v2292_v15 = vpop.f32.mrf.mxu1 }
 0x1b4   : > { %v2495_v47 = vpop.f32.mrf.mxu0  ;;  %v2293_v42 = vadd.f32 %v2292_v15, %v2021_v0 }
 0x1b5   : > { %v5243_v53 = vpop.f32.mrf.mxu1 }
 0x1b6   : > { %2363 = vxpose.xlu1.b32.cont [6/16] (narrow) %v2263_v12, 8  ;;  %2339 = vxpose.xlu0.b32.cont [14/16] (narrow) %v2215_v6, 8  ;;  %v2497_v31 = vpop.f32.mrf.mxu0  ;;  %v2027_v6 = vadd.f32 %v5219_v29, %v5168_v43 }
 0x1b7   : > { %v5248_v52 = vpop.f32.mrf.mxu1 }
 0x1b8   : > { %v2654_v54 = vpop.f32.mrf.mxu0  ;;  %v2299_v9 = vadd.f32 %v5235_v14, %v2027_v6 }
 0x1b9   : > { %v5251_v34 = vpop.f32.mrf.mxu1 }
 0x1ba   : > { %2364 = vxpose.xlu1.b32.cont [7/16] (narrow) %v2269_v55, 8  ;;  %2340 = vxpose.xlu0.b32.cont [15/16] (narrow) %v2221_v41, 8  ;;  %v2656_v5 = vpop.f32.mrf.mxu0 }
 0x1bb   : > { %v5257_v59 = vpop.f32.mrf.mxu1 }
 0x1bc   : > { %v2808_v27 = vpop.f32.mrf.mxu0 }
 0x1bd   : > { %v2577_v21 = vpop.f32.mrf.mxu1 }
 0x1be   : > { %2365 = vxpose.xlu1.b32.cont [8/16] (narrow) %v2275_v44, 8  ;;  %2341 = vxpose.xlu0.b32.end [16/16] (narrow) %v2227_v32, 8  ;;  %v2578_v63 = vadd.f32 %v2577_v21, %v2495_v47  ;;  %v2810_v49 = vpop.f32.mrf.mxu0 }
 0x1bf   : > { %v2579_v3 = vpop.f32.mrf.mxu1 }
 0x1c0   : > { %v2580_v24 = vadd.f32 %v2579_v3, %v2497_v31  ;;  %v2655_v2 = vadd.f32 %v2654_v54, %v2578_v63  ;;  %v2033_v31 = vadd.f32 %v5231_v17, %v5175_v56  ;;  %v2039_v54 = vadd.f32 %v5226_v62, %v5173_v22 }
 0x1c1   : > { %v2730_v46 = vpop.f32.mrf.mxu1  ;;  %v2045_v17 = vadd.f32 %v5240_v18, %v5182_v60  ;;  %v2323_v62 = vadd.f32 %v5251_v34, %v2051_v30 }
 0x1c2   : > { %2366 = vxpose.xlu1.b32.cont [9/16] (narrow) %v2281_v23, 8  ;;  %v2657_v16 = vadd.f32 %v2656_v5, %v2580_v24  ;;  %v2731_v57 = vadd.f32 %v2730_v46, %v2655_v2  ;;  %v2305_v14 = vadd.f32 %v5248_v52, %v2033_v31  ;;  %v2311_v56 = vadd.f32 %v5243_v53, %v2039_v54 }
 0x1c3   : > { %v2732_v26 = vpop.f32.mrf.mxu1  ;;  %v2317_v52 = vadd.f32 %v5257_v59, %v2045_v17 }
 0x1c4   : > { %v2733_v58 = vadd.f32 %v2732_v26, %v2657_v16  ;;  %v2809_v8 = vadd.f32 %v2808_v27, %v2731_v57 }
 0x1c5   : > { %v2882_v48 = vpop.f32.mrf.mxu1 }
 0x1c6   : > { %2367 = vxpose.xlu1.b32.cont [10/16] (narrow) %v2287_v40, 8  ;;  %v2811_v1 = vadd.f32 %v2810_v49, %v2733_v58  ;;  %v2883_v20 = vadd.f32 %v2882_v48, %v2809_v8 }
 0x1c7   : > { %v2884_v37 = vpop.f32.mrf.mxu1 }
 0x1c8   : > { %v5265_v45 = vmax.f32 %v2883_v20, 0.0  ;;  %v2889_v19 = vand.u32 2147483647, %v2883_v20  ;;  %v2885_v13 = vadd.f32 %v2884_v37, %v2811_v1 }
 0x1ca   : > { %2368 = vxpose.xlu1.b32.cont [11/16] (narrow) %v2293_v42, 8  ;;  %v2891_v12 = vsub.f32 0.0, %v2889_v19  ;;  %v5272_v47 = vmax.f32 %v2885_v13, 0.0  ;;  %v2890_v11 = vand.u32 2147483647, %v2885_v13  ;;  %v2915_v48 = vrot.slane %v5265_v45, 7 }
 0x1cc   : > { %v2893_v4 = vmul.f32 1.442695, %v2891_v12  ;;  %v2892_v39 = vsub.f32 0.0, %v2890_v11  ;;  %v2957_v15 = vcombine.low %v5265_v45, %v5272_v47 }
 0x1ce   : > { %2369 = vxpose.xlu1.b32.cont [12/16] (narrow) %v2299_v9, 8  ;;  %3909 = vpow2.f32 %v2893_v4  ;;  %v2895_v43 = vmul.f32 1.442695, %v2892_v39  ;;  %v2964_v29 = vrot.slane %v2957_v15, %v5267_v25  ;;  %v2916_v4 = vrot.slane %v5272_v47, 7 }
 0x1d0   : > { %3911 = vpow2.f32 %v2895_v43  ;;  %v2971_v55 = vrot.slane %v2964_v29, %v5267_v25 }
 0x1d2   : > { %2370 = vxpose.xlu1.b32.cont [13/16] (narrow) %v2305_v14, 8  ;;  %3109 = vst.msk [vmem:[%s5290_s12 + $0x1] ss:$4 sm:$0x3] %vm5282_vm3, %v2971_v55 }
 0x1d6   : > { %2371 = vxpose.xlu1.b32.cont [14/16] (narrow) %v2311_v56, 8 }
 0x1da   : > { %2372 = vxpose.xlu1.b32.cont [15/16] (narrow) %v2317_v52, 8 }
 0x1db   : > { %v3910_v22 = vpop.eup %3909 }
 0x1dc   : > { %v2897_v10 = vadd.f32 1.0, %v3910_v22 }
 0x1dd   : > { %v3912_v5 = vpop.eup %3911 }
 0x1de   : > { %2373 = vxpose.xlu1.b32.end [16/16] (narrow) %v2323_v62, 8  ;;  %3913 = vlog2.f32 %v2897_v10  ;;  %v2898_v32 = vadd.f32 1.0, %v3912_v5 }
 0x1e0   : > { %3915 = vlog2.f32 %v2898_v32 }
 0x1eb   : > { %v3914_v53 = vpop.eup %3913 }
 0x1ec   : > { %v2900_v44 = vmul.f32 0.6931472, %v3914_v53 }
 0x1ed   : > { %v3916_v21 = vpop.eup %3915 }
 0x1ee   : > { %v2903_v60 = vadd.f32 %v2900_v44, %v5265_v45  ;;  %v2902_v18 = vmul.f32 0.6931472, %v3916_v21 }
 0x1f0   : > { %v2904_v59 = vadd.f32 %v2902_v18, %v5272_v47 }
 0x1fe   : > { %v2342_v38 = vpop.trf.xlu0 }
 0x1ff   : > { %v2392_v61 = vand.u32 2147483647, %v2342_v38  ;;  %v2390_v50 = vmax.f32 %v2342_v38, 0.0  ;;  %v2925_v1 = vrot.slane %v2342_v38, 7 }
 0x201   : > { %v2394_v51 = vsub.f32 0.0, %v2392_v61 }
 0x203   : > { %v2396_v63 = vmul.f32 1.442695, %v2394_v51 }
 0x205   : > { %3917 = vpow2.f32 %v2396_v63 }
 0x212   : > { %v3918_v34 = vpop.eup %3917 }
 0x213   : > { %v2400_v3 = vadd.f32 1.0, %v3918_v34 }
 0x215   : > { %3919 = vlog2.f32 %v2400_v3 }
 0x21e   : > { %v2374_v27 = vpop.trf.xlu1 }
 0x21f   : > { %v2393_v23 = vand.u32 2147483647, %v2374_v27  ;;  %v2975_v24 = vcombine.low %v2342_v38, %v2374_v27  ;;  %v2391_v19 = vmax.f32 %v2374_v27, 0.0  ;;  %v2926_v31 = vrot.slane %v2374_v27, 7 }
 0x221   : > { %v2395_v2 = vsub.f32 0.0, %v2393_v23  ;;  %v2982_v46 = vrot.slane %v2975_v24, %v5267_v25 }
 0x222   : > { %v3920_v28 = vpop.eup %3919 }
 0x223   : > { %v2403_v33 = vmul.f32 0.6931472, %v3920_v28  ;;  %v2398_v36 = vmul.f32 1.442695, %v2395_v2  ;;  %v2989_v16 = vrot.slane %v2982_v46, %v5267_v25 }
 0x225   : > { %v2406_v57 = vadd.f32 %v2403_v33, %v2390_v50  ;;  %3921 = vpow2.f32 %v2398_v36  ;;  %3110 = vst.msk [vmem:[%s5290_s12 + $0x2] ss:$4 sm:$0x3] %vm5282_vm3, %v2989_v16 }
 0x227   : > { %v2905_v26 = vadd.f32 %v2903_v60, %v2406_v57 }
 0x229   : > { %v2907_v49 = vadd.f32 1e-06, %v2905_v26 }
 0x22b   : > { %3923 = vrcp.f32 %v2907_v49 }
 0x232   : > { %v3922_v40 = vpop.eup %3921 }
 0x233   : > { %v2401_v58 = vadd.f32 1.0, %v3922_v40 }
 0x235   : > { %3925 = vlog2.f32 %v2401_v58 }
 0x238   : > { %v3924_v8 = vpop.eup %3923 }
 0x239   : > { %v2911_v7 = vmul.f32 %v3924_v8, %v2903_v60 }
 0x23b   : > { %v2919_v35 = vmul.f32 %v2915_v48, %v2911_v7  ;;  %v2921_v0 = vsub.f32 1.0, %v2911_v7 }
 0x23d   : > { %v2929_v20 = vmul.f32 %v2925_v1, %v2921_v0 }
 0x23f   : > { %v2931_v37 = vadd.f32 %v2929_v20, %v2919_v35 }
 0x242   : > { %v3926_v42 = vpop.eup %3925 }
 0x243   : > { %v2405_v13 = vmul.f32 0.6931472, %v3926_v42 }
 0x245   : > { %v2407_v6 = vadd.f32 %v2405_v13, %v2391_v19 }
 0x247   : > { %v2906_v12 = vadd.f32 %v2904_v59, %v2407_v6 }
 0x249   : > { %v2908_v11 = vadd.f32 1e-06, %v2906_v12 }
 0x24b   : > { %3927 = vrcp.f32 %v2908_v11 }
 0x258   : > { %v3928_v9 = vpop.eup %3927 }
 0x259   : > { %v2912_v45 = vmul.f32 %v3928_v9, %v2904_v59 }
 0x25b   : > { %v2920_v39 = vmul.f32 %v2916_v4, %v2912_v45  ;;  %v2922_v15 = vsub.f32 1.0, %v2912_v45  ;;  %v2995_v43 = vcombine.low %v2911_v7, %v2912_v45 }
 0x25d   : > { %v2930_v29 = vmul.f32 %v2926_v31, %v2922_v15  ;;  %v3002_v14 = vrot.slane %v2995_v43, %v5267_v25 }
 0x25f   : > { %v2932_v55 = vadd.f32 %v2930_v29, %v2920_v39  ;;  %v3003_v54 = vcombine.high %v3002_v14, %v3002_v14 }
 0x261   : > { %v2935_v56 = vcombine.low %v2931_v37, %v2932_v55  ;;  %v3010_v17 = vrot.slane %v3003_v54, %v5267_v25 }
 0x263   : > { %v2942_v52 = vrot.slane %v2935_v56, %v5267_v25  ;;  %3111 = vst.msk [vmem:[%s5290_s12 + $0x3] ss:$4 sm:$0x3] %vm5282_vm3, %v3010_v17 }
 0x265   : > { %v2943_v47 = vcombine.high %v2942_v52, %v2942_v52 }
 0x267   : > { %v2950_v30 = vrot.slane %v2943_v47, %v5267_v25 }
 0x269   : > { %2956 = vst.msk [vmem:[%s5290_s12] ss:$4 sm:$0x3] %vm5282_vm3, %v2950_v30 }
 0x26a   : > { %3942 = shalt.err (!%p3939_p4)
}
 0x26b   : > { %s3943_s30 = scalar_lea.hbm %s3027_s22, 128  ;;  %s3947_s8 = scalar_lea.hbm %s5361_s4, 256 }
 0x26c   : > { %p3944_p7 = scmp.ne.s32.totalorder %s3027_s22, %s3943_s30  ;;  %p3948_p10 = scmp.lt.s32.totalorder %s3027_s22, %s5361_s4 }
 0x26d   : > { %p3949_p11 = scmp.lt.s32.totalorder %s3947_s8, %s3943_s30 }
 0x26e   : > { %p3945_p8 = pnand %p3944_p7, %p4057_p5 }
 0x26f   : > { %p3950_p12 = por %p3949_p11, %p3948_p10 }
 0x270   : > { %p3946_p9 = pneg %p3945_p8 }
 0x272   : > { %p3951_p13 = pnand %p3950_p12, %p3946_p9 }
 0x274   : > { %3954 = shalt.err (!%p3951_p13)
}
 0x275   : > { %3868 = dma.vmem_to_hbm [thread:$0]  (%p4057_p5), %s3030_s7, 128, %s3027_s22, %s3015_s23  }
 0x276 PF: > { %p3874_p0 = scmp.ge.s32.totalorder %s3989_s18, 2  ;;  %s3041_s11 = sand.u32 1, %s3977_s15  }
 0x277   : > { %s3042_s12 = scalar_lea.sflag [#allocation3], %s3041_s11 }
 0x278   : > { %p3871_p1 = pnand %p3874_p0, %p4061_p6 }
 0x27a   : > { %p3872_p2 = pneg %p3871_p1 }
 0x27c   : > { %3972 = dma.done.wait (%p3872_p2), %s3042_s12, 128  }
 0x27d   : > { %3974 = vsyncadd (%p3872_p2), %s3042_s12, 4294967168  ;;  %p14_p3 = scmp.ge.s32.totalorder %s4044_s21, 4   ;;  %s5614_s15 = smov %s3981_s16 }
 0x27e   : > { %s5615_s16 = smov %s3985_s17  ;;  %s5616_s17 = smov %s4055_s24 }
 0x27f   : > { %s5617_s18 = smov %s4044_s21  ;;  %16 = sbr.rel (!%p14_p3) target bundleno = 3 (0x3), region = 77 }
 0x284   :  { %3047 = vsyncpa [#allocation3], 1 }
 0x285   :  { %3049 = vsyncpa [#allocation3 + $0x1], 1 }

</bundles_post_ra>
